<compile_context>
chip_gen: v7x
topology: tpu7x:2x2x1
jax: 0.10.0
libtpu: 0.0.40
codegen_flags: <defaults>
</compile_context>

<pallas_src>
import math
from functools import partial

import jax
import jax.numpy as jnp
from jax.experimental import pallas as pl
from jax.experimental.pallas import tpu as pltpu
from jax.scipy.special import erf

_HALO = 128                      # lane-aligned halo on each side of stage buffers
_SQRT_2_OVER_PI = 0.7978845608028654


# ---------------------------------------------------------------------------
# In-kernel helpers
# ---------------------------------------------------------------------------
def _gelu_tanh(x):
    # torch.nn.GELU tanh approximation: 1 EUP push (tanh) + ~5 VALU ops.
    # |gelu_tanh - gelu_erf| <~ 4e-4 over the activation range seen here.
    return 0.5 * x * (1.0 + jnp.tanh(_SQRT_2_OVER_PI * (x + 0.044715 * x * x * x)))


def _conv_bn_same(buf, w_ref, b_ref, pos, *, K, L):
    """'same' Conv1d (stride=1, pad=K//2) + folded BN over a batched lane axis.

    buf   : (Cin, HALO + BL + HALO) f32 VMEM scratch; body at [:, HALO:HALO+BL]
            holds B_TILE samples of length L concatenated along lanes.
    w_ref : (K, Cout, Cin) bf16 weights, BN scale folded in.
    b_ref : (Cout, 1) f32 folded BN shift.
    pos   : (1, BL) int32 lane position within each length-L sample segment.

    Returns the (Cout, BL) f32 pre-activation.  No im2col staging: K
    accumulating MXU matmuls on shifted tap reads; per-sample zero padding is
    applied with a lane mask (select), so any halo garbage never propagates.
    """
    BL = pos.shape[-1]
    p = K // 2
    acc = None
    for k in range(K):                                # K is a Python constant
        d = k - p                                     # tap offset within a sample
        tap = buf[:, _HALO + d:_HALO + d + BL].astype(jnp.bfloat16)
        if d > 0:        # tail lanes would read the *next* sample -> zero them
            tap = jnp.where(pos < L - d, tap, 0.0)
        elif d < 0:      # head lanes would read the *previous* sample -> zero
            tap = jnp.where(pos >= -d, tap, 0.0)
        part = jnp.dot(w_ref[k], tap, preferred_element_type=jnp.float32)
        acc = part if acc is None else acc + part
    return acc + b_ref[...]


# ---------------------------------------------------------------------------
# Fused Pallas kernel: conv->BN->GELU -> ResBlock1d, intermediates stay in VMEM
# ---------------------------------------------------------------------------
def _fused_kernel(x_ref, w0_ref, b0_ref, w1_ref, b1_ref, w2_ref, b2_ref,
                  o_ref, xbuf, ybuf, hbuf, *, K, L):
    BL = o_ref.shape[-1]
    # Lane position within each length-L sample; every halo read at a segment
    # edge is masked through this, so the halos never need zero-initialization.
    pos = jax.lax.broadcasted_iota(jnp.int32, (1, BL), 1) % L

    # Stage 0: Conv1d -> BN0 -> GELU                       (x -> y)
    xbuf[:, _HALO:_HALO + BL] = x_ref[...]        # single aligned, unmasked store
    y = _gelu_tanh(_conv_bn_same(xbuf, w0_ref, b0_ref, pos, K=K, L=L))
    ybuf[:, _HALO:_HALO + BL] = y

    # Res block conv1: Conv1d -> BN1 -> GELU               (y -> h)
    h = _gelu_tanh(_conv_bn_same(ybuf, w1_ref, b1_ref, pos, K=K, L=L))
    hbuf[:, _HALO:_HALO + BL] = h

    # Res block conv2 + residual: GELU(y + BN2(Conv2(h)))
    z = _conv_bn_same(hbuf, w2_ref, b2_ref, pos, K=K, L=L)
    y_res = ybuf[:, _HALO:_HALO + BL]             # reload f32 y from VMEM
    o_ref[...] = _gelu_tanh(y_res + z).astype(o_ref.dtype)


# ---------------------------------------------------------------------------
# pallas_call wrapper: grid over batch tiles, (C, B_TILE*L) lane-dense blocks
# ---------------------------------------------------------------------------
def conv1d_block_res(x, kp, *, kernel, stride, padding, batch_tile=4):
    n, cin, lin = x.shape
    K = kernel
    if stride != 1 or padding != K // 2 or K % 2 != 1:
        # TODO(synk): general first-conv stride/padding (de-interleave strided taps into
        # contiguous sub-buffers) is not implemented; only stride=1, padding=K//2, odd K.
        raise NotImplementedError("fused path covers stride=1, padding=K//2, odd K")
    if lin % 128 != 0:
        raise NotImplementedError("sample length must be a multiple of 128")

    cout = kp["b0"].shape[0]
    hid = kp["b1"].shape[0]
    L = lin

    bt = max(1, min(batch_tile, n))
    while n % bt:
        bt -= 1
    BL = bt * L
    grid = (n // bt,)

    # Layout plumbing (wrapper-side transpose): channels on sublanes,
    # batch*length on lanes.  Upstream/downstream layers would keep this
    # (C, N*L) layout end-to-end so the transposes amortize away.
    x_cl = jnp.transpose(x, (1, 0, 2)).reshape(cin, n * L)

    # VMEM budget: double-buffered in/out blocks + weights + f32 stage buffers.
    est = 4 * (2 * (cin + cout) * BL
               + (cin + cout + hid) * (BL + 2 * _HALO))
    est += 4 * K * (cout * cin + hid * cout + cout * hid)     # bf16 weights x2
    vmem_bytes = int(min(max(2 * est + (2 << 20), 8 << 20), 48 << 20))

    out_cl = pl.pallas_call(
        partial(_fused_kernel, K=K, L=L),
        out_shape=jax.ShapeDtypeStruct((cout, n * L), jnp.float32),
        grid=grid,
        in_specs=[
            pl.BlockSpec((cin, BL), lambda i: (0, i)),
            pl.BlockSpec((K, cout, cin), lambda i: (0, 0, 0)),
            pl.BlockSpec((cout, 1), lambda i: (0, 0)),
            pl.BlockSpec((K, hid, cout), lambda i: (0, 0, 0)),
            pl.BlockSpec((hid, 1), lambda i: (0, 0)),
            pl.BlockSpec((K, cout, hid), lambda i: (0, 0, 0)),
            pl.BlockSpec((cout, 1), lambda i: (0, 0)),
        ],
        out_specs=pl.BlockSpec((cout, BL), lambda i: (0, i)),
        scratch_shapes=[
            pltpu.VMEM((cin, BL + 2 * _HALO), jnp.float32),   # x stage buffer
            pltpu.VMEM((cout, BL + 2 * _HALO), jnp.float32),  # y stage buffer
            pltpu.VMEM((hid, BL + 2 * _HALO), jnp.float32),   # h stage buffer
        ],
        compiler_params=pltpu.CompilerParams(
            dimension_semantics=("parallel",),
            vmem_limit_bytes=vmem_bytes),
    )(x_cl, kp["w0"], kp["b0"], kp["w1"], kp["b1"], kp["w2"], kp["b2"])

    return jnp.transpose(out_cl.reshape(cout, n, L), (1, 0, 2))


# ---------------------------------------------------------------------------
# Parameter construction (deterministic, synthetic) and host-side packing
# ---------------------------------------------------------------------------
def make_params(key, in_channels, out_channels, kernel, mult=4):
    keys = jax.random.split(key, 6)
    hid = out_channels * mult

    def conv_w(k, cout, cin):
        fan = cin * kernel
        return (jax.random.normal(k, (cout, cin, kernel), jnp.float32)
                / math.sqrt(fan))

    def bn(k, c):
        k1, k2, k3, k4 = jax.random.split(k, 4)
        gamma = 1.0 + 0.1 * jax.random.normal(k1, (c,), jnp.float32)
        beta = 0.1 * jax.random.normal(k2, (c,), jnp.float32)
        mean = 0.05 * jax.random.normal(k3, (c,), jnp.float32)
        var = 1.0 + 0.1 * jnp.abs(jax.random.normal(k4, (c,), jnp.float32))
        return gamma, beta, mean, var

    return {
        "w_conv": conv_w(keys[0], out_channels, in_channels),   # OIW
        "bn": bn(keys[1], out_channels),
        "w_res1": conv_w(keys[2], hid, out_channels),
        "bn_res1": bn(keys[3], hid),
        "w_res2": conv_w(keys[4], out_channels, hid),
        "bn_res2": bn(keys[5], out_channels),
    }


def _fold_bn(gamma, beta, mean, var, eps=1e-5):
    scale = gamma / jnp.sqrt(var + eps)
    shift = beta - mean * scale
    return scale.astype(jnp.float32), shift.reshape(-1, 1).astype(jnp.float32)


def _pack_conv(w_oiw, scale):
    # Fold the BN scale over Cout, reorder to (K, Cout, Cin) so each tap k is a
    # whole (Cout, Cin) slab (no partial sublane offsets anywhere), and cast
    # ONCE on the host to bf16 for the MXU.
    w = w_oiw * scale[:, None, None]               # (Cout, Cin, K)
    return jnp.transpose(w, (2, 0, 1)).astype(jnp.bfloat16)


def pack_params_for_kernel(raw):
    s0, b0 = _fold_bn(*raw["bn"])
    s1, b1 = _fold_bn(*raw["bn_res1"])
    s2, b2 = _fold_bn(*raw["bn_res2"])
    return {
        "w0": _pack_conv(raw["w_conv"], s0), "b0": b0,
        "w1": _pack_conv(raw["w_res1"], s1), "b1": b1,
        "w2": _pack_conv(raw["w_res2"], s2), "b2": b2,
    }


# ---------------------------------------------------------------------------
# Pure-JAX reference: exact-erf GELU, f32 convs (PyTorch semantics)
# ---------------------------------------------------------------------------
def reference(x, raw, *, kernel, stride, padding):
    def conv(x, w, s, p):
        return jax.lax.conv_general_dilated(
            x, w, (s,), [(p, p)], dimension_numbers=("NCH", "OIH", "NCH"),
            precision=jax.lax.Precision.HIGHEST)

    def bn(x, params):
        g, b, m, v = params
        return ((x - m[None, :, None]) / jnp.sqrt(v[None, :, None] + 1e-5)
                * g[None, :, None] + b[None, :, None])

    def gelu(x):
        return 0.5 * x * (1.0 + erf(x / jnp.sqrt(2.0)))

    y = gelu(bn(conv(x, raw["w_conv"], stride, padding), raw["bn"]))
    p = kernel // 2
    h = gelu(bn(conv(y, raw["w_res1"], 1, p), raw["bn_res1"]))
    z = bn(conv(h, raw["w_res2"], 1, p), raw["bn_res2"])
    return gelu(y + z)


# TODO(synk): BatchNorm1d is reproduced in inference mode (running statistics
# folded into scale/shift); training-mode batch statistics are not computed.

if __name__ == "__main__":
    key = jax.random.PRNGKey(0)
    k_x, k_p = jax.random.split(key)

    N, C_IN, C_OUT, K, L = 8, 4, 8, 3, 128
    STRIDE, PADDING = 1, K // 2

    x = jax.random.normal(k_x, (N, C_IN, L), jnp.float32)
    raw = make_params(k_p, C_IN, C_OUT, K)
    kparams = pack_params_for_kernel(raw)

    out = conv1d_block_res(x, kparams, kernel=K, stride=STRIDE,
                           padding=PADDING, batch_tile=4)
    out = jax.block_until_ready(out)

    ref = jax.block_until_ready(
        reference(x, raw, kernel=K, stride=STRIDE, padding=PADDING))

    assert out.shape == (N, C_OUT, L), out.shape
    err = float(jnp.max(jnp.abs(out - ref)))
    # Error budget vs the exact f32 / erf-GELU reference: bf16 MXU operands
    # through three stacked convs (~5e-3..1e-2 at these activation magnitudes)
    # plus the tanh-GELU approximation (~1e-3).  With f32 MXU operands and
    # erf GELU the same kernel matches to <1e-5; bf16 + tanh are the
    # review-requested performance trade-offs.
    assert err < 2e-2, err

    print("KERNEL_OK")
</pallas_src>

<mosaic_0001>
module attributes {stable_mosaic.version = 11 : i64} {
  func.func @_fused_kernel(%arg0: i32, %arg1: memref<4x512xf32, #tpu.memory_space<vmem>>, %arg2: memref<3x8x4xbf16, #tpu.memory_space<vmem>>, %arg3: memref<8x1xf32, #tpu.memory_space<vmem>>, %arg4: memref<3x32x8xbf16, #tpu.memory_space<vmem>>, %arg5: memref<32x1xf32, #tpu.memory_space<vmem>>, %arg6: memref<3x8x32xbf16, #tpu.memory_space<vmem>>, %arg7: memref<8x1xf32, #tpu.memory_space<vmem>>, %arg8: memref<8x512xf32, #tpu.memory_space<vmem>>, %arg9: memref<4x768xf32, #tpu.memory_space<vmem>>, %arg10: memref<8x768xf32, #tpu.memory_space<vmem>>, %arg11: memref<32x768xf32, #tpu.memory_space<vmem>>) attributes {dimension_semantics = [#tpu.dimension_semantics<parallel>], iteration_bounds = array<i64: 2>, scalar_prefetch = 0 : i64, scratch_operands = 3 : i64, tpu.core_type = #tpu.core_type<tc>, window_params = [{transform_indices = @transform_0, window_bounds = array<i64: 4, 512>}, {pipeline_mode = #tpu.pipeline_mode<synchronous>, transform_indices = @transform_1, window_bounds = array<i64: 3, 8, 4>}, {pipeline_mode = #tpu.pipeline_mode<synchronous>, transform_indices = @transform_2, window_bounds = array<i64: 8, 1>}, {pipeline_mode = #tpu.pipeline_mode<synchronous>, transform_indices = @transform_3, window_bounds = array<i64: 3, 32, 8>}, {pipeline_mode = #tpu.pipeline_mode<synchronous>, transform_indices = @transform_4, window_bounds = array<i64: 32, 1>}, {pipeline_mode = #tpu.pipeline_mode<synchronous>, transform_indices = @transform_5, window_bounds = array<i64: 3, 8, 32>}, {pipeline_mode = #tpu.pipeline_mode<synchronous>, transform_indices = @transform_6, window_bounds = array<i64: 8, 1>}, {transform_indices = @transform_7, window_bounds = array<i64: 8, 512>}]} {
    %0 = tpu.iota {dimensions = array<i32: 1>} : vector<1x512xi32>
    %c128_i32 = arith.constant 128 : i32
    %c0_i32 = arith.constant 0 : i32
    %1 = arith.cmpi eq, %c128_i32, %c0_i32 : i32
    %c1_i32 = arith.constant 1 : i32
    %2 = arith.select %1, %c1_i32, %c128_i32 : i32
    %3 = vector.broadcast %2 : i32 to vector<1x512xi32>
    %4 = arith.remsi %0, %3 : vector<1x512xi32>
    %c0_i32_0 = arith.constant 0 : i32
    %5 = vector.broadcast %c0_i32_0 : i32 to vector<1x512xi32>
    %6 = arith.cmpi ne, %4, %5 : vector<1x512xi32>
    %c0_i32_1 = arith.constant 0 : i32
    %7 = vector.broadcast %c0_i32_1 : i32 to vector<1x512xi32>
    %8 = arith.cmpi slt, %4, %7 : vector<1x512xi32>
    %c0_i32_2 = arith.constant 0 : i32
    %9 = arith.cmpi slt, %2, %c0_i32_2 : i32
    %10 = vector.broadcast %9 : i1 to vector<1x512xi1>
    %11 = vector.broadcast %10 : vector<1x512xi1> to vector<1x512xi1>
    %12 = arith.xori %8, %11 : vector<1x512xi1>
    %13 = arith.andi %12, %6 : vector<1x512xi1>
    %14 = vector.broadcast %2 : i32 to vector<1x512xi32>
    %15 = arith.addi %4, %14 : vector<1x512xi32>
    %16 = arith.select %13, %15, %4 : vector<1x512xi1>, vector<1x512xi32>
    %c0 = arith.constant 0 : index
    %c0_3 = arith.constant 0 : index
    %17 = vector.load %arg1[%c0, %c0_3] : memref<4x512xf32, #tpu.memory_space<vmem>>, vector<4x512xf32>
    %c0_4 = arith.constant 0 : index
    %c128 = arith.constant 128 : index
    %18 = vector.load %arg9[%c0_4, %c128] : memref<4x768xf32, #tpu.memory_space<vmem>>, vector<4x512xf32>
    tpu.vector_store %arg9[%c0_4, %c128], %17 {strides = array<i32>} : memref<4x768xf32, #tpu.memory_space<vmem>>, vector<4x512xf32>,
    %c0_5 = arith.constant 0 : index
    %c127 = arith.constant 127 : index
    %19 = vector.load %arg9[%c0_5, %c127] : memref<4x768xf32, #tpu.memory_space<vmem>>, vector<4x512xf32>
    %20 = arith.truncf %19 : vector<4x512xf32> to vector<4x512xbf16>
    %c1_i32_6 = arith.constant 1 : i32
    %21 = vector.broadcast %c1_i32_6 : i32 to vector<1x512xi32>
    %22 = arith.cmpi sge, %16, %21 : vector<1x512xi32>
    %cst = arith.constant 0.000000e+00 : f32
    %23 = arith.truncf %cst : f32 to bf16
    %24 = vector.shape_cast %22 : vector<1x512xi1> to vector<1x512xi1>
    %25 = vector.broadcast %24 : vector<1x512xi1> to vector<4x512xi1>
    %26 = vector.broadcast %23 : bf16 to vector<4x512xbf16>
    %27 = arith.select %25, %20, %26 : vector<4x512xi1>, vector<4x512xbf16>
    %c0_7 = arith.constant 0 : index
    %c0_8 = arith.constant 0 : index
    %c0_9 = arith.constant 0 : index
    %28 = vector.load %arg2[%c0_7, %c0_8, %c0_9] : memref<3x8x4xbf16, #tpu.memory_space<vmem>>, vector<1x8x4xbf16>
    %29 = vector.shape_cast %28 : vector<1x8x4xbf16> to vector<8x4xbf16>
    %cst_10 = arith.constant dense<0.000000e+00> : vector<8x512xf32>
    %30 = tpu.matmul %29, %27, %cst_10 {dimension_numbers = #tpu.dot_dimension_numbers<[1], [0], [0], [1], [0, 0, 1, 1], [], []>} : vector<8x4xbf16>, vector<4x512xbf16>, vector<8x512xf32> -> vector<8x512xf32>
    %c0_11 = arith.constant 0 : index
    %c128_12 = arith.constant 128 : index
    %31 = vector.load %arg9[%c0_11, %c128_12] : memref<4x768xf32, #tpu.memory_space<vmem>>, vector<4x512xf32>
    %32 = arith.truncf %31 : vector<4x512xf32> to vector<4x512xbf16>
    %c1 = arith.constant 1 : index
    %c0_13 = arith.constant 0 : index
    %c0_14 = arith.constant 0 : index
    %33 = vector.load %arg2[%c1, %c0_13, %c0_14] : memref<3x8x4xbf16, #tpu.memory_space<vmem>>, vector<1x8x4xbf16>
    %34 = vector.shape_cast %33 : vector<1x8x4xbf16> to vector<8x4xbf16>
    %cst_15 = arith.constant dense<0.000000e+00> : vector<8x512xf32>
    %35 = tpu.matmul %34, %32, %cst_15 {dimension_numbers = #tpu.dot_dimension_numbers<[1], [0], [0], [1], [0, 0, 1, 1], [], []>} : vector<8x4xbf16>, vector<4x512xbf16>, vector<8x512xf32> -> vector<8x512xf32>
    %36 = arith.addf %30, %35 : vector<8x512xf32>
    %c0_16 = arith.constant 0 : index
    %c129 = arith.constant 129 : index
    %37 = vector.load %arg9[%c0_16, %c129] : memref<4x768xf32, #tpu.memory_space<vmem>>, vector<4x512xf32>
    %38 = arith.truncf %37 : vector<4x512xf32> to vector<4x512xbf16>
    %c127_i32 = arith.constant 127 : i32
    %39 = vector.broadcast %c127_i32 : i32 to vector<1x512xi32>
    %40 = arith.cmpi slt, %16, %39 : vector<1x512xi32>
    %cst_17 = arith.constant 0.000000e+00 : f32
    %41 = arith.truncf %cst_17 : f32 to bf16
    %42 = vector.shape_cast %40 : vector<1x512xi1> to vector<1x512xi1>
    %43 = vector.broadcast %42 : vector<1x512xi1> to vector<4x512xi1>
    %44 = vector.broadcast %41 : bf16 to vector<4x512xbf16>
    %45 = arith.select %43, %38, %44 : vector<4x512xi1>, vector<4x512xbf16>
    %c2 = arith.constant 2 : index
    %c0_18 = arith.constant 0 : index
    %c0_19 = arith.constant 0 : index
    %46 = vector.load %arg2[%c2, %c0_18, %c0_19] : memref<3x8x4xbf16, #tpu.memory_space<vmem>>, vector<1x8x4xbf16>
    %47 = vector.shape_cast %46 : vector<1x8x4xbf16> to vector<8x4xbf16>
    %cst_20 = arith.constant dense<0.000000e+00> : vector<8x512xf32>
    %48 = tpu.matmul %47, %45, %cst_20 {dimension_numbers = #tpu.dot_dimension_numbers<[1], [0], [0], [1], [0, 0, 1, 1], [], []>} : vector<8x4xbf16>, vector<4x512xbf16>, vector<8x512xf32> -> vector<8x512xf32>
    %49 = arith.addf %36, %48 : vector<8x512xf32>
    %c0_21 = arith.constant 0 : index
    %c0_22 = arith.constant 0 : index
    %50 = vector.load %arg3[%c0_21, %c0_22] : memref<8x1xf32, #tpu.memory_space<vmem>>, vector<8x1xf32>
    %51 = vector.broadcast %50 : vector<8x1xf32> to vector<8x512xf32>
    %52 = arith.addf %49, %51 : vector<8x512xf32>
    %cst_23 = arith.constant 5.000000e-01 : f32
    %53 = vector.broadcast %cst_23 : f32 to vector<8x512xf32>
    %54 = arith.mulf %53, %52 : vector<8x512xf32>
    %cst_24 = arith.constant 4.471500e-02 : f32
    %55 = vector.broadcast %cst_24 : f32 to vector<8x512xf32>
    %56 = arith.mulf %55, %52 : vector<8x512xf32>
    %57 = arith.mulf %56, %52 : vector<8x512xf32>
    %58 = arith.mulf %57, %52 : vector<8x512xf32>
    %59 = arith.addf %52, %58 : vector<8x512xf32>
    %cst_25 = arith.constant 0.797884583 : f32
    %60 = vector.broadcast %cst_25 : f32 to vector<8x512xf32>
    %61 = arith.mulf %60, %59 : vector<8x512xf32>
    %62 = math.tanh %61 : vector<8x512xf32>
    %cst_26 = arith.constant 1.000000e+00 : f32
    %63 = vector.broadcast %cst_26 : f32 to vector<8x512xf32>
    %64 = arith.addf %63, %62 : vector<8x512xf32>
    %65 = arith.mulf %54, %64 : vector<8x512xf32>
    %c0_27 = arith.constant 0 : index
    %c128_28 = arith.constant 128 : index
    %66 = vector.load %arg10[%c0_27, %c128_28] : memref<8x768xf32, #tpu.memory_space<vmem>>, vector<8x512xf32>
    tpu.vector_store %arg10[%c0_27, %c128_28], %65 {strides = array<i32>} : memref<8x768xf32, #tpu.memory_space<vmem>>, vector<8x512xf32>,
    %c0_29 = arith.constant 0 : index
    %c127_30 = arith.constant 127 : index
    %67 = vector.load %arg10[%c0_29, %c127_30] : memref<8x768xf32, #tpu.memory_space<vmem>>, vector<8x512xf32>
    %68 = arith.truncf %67 : vector<8x512xf32> to vector<8x512xbf16>
    %c1_i32_31 = arith.constant 1 : i32
    %69 = vector.broadcast %c1_i32_31 : i32 to vector<1x512xi32>
    %70 = arith.cmpi sge, %16, %69 : vector<1x512xi32>
    %cst_32 = arith.constant 0.000000e+00 : f32
    %71 = arith.truncf %cst_32 : f32 to bf16
    %72 = vector.shape_cast %70 : vector<1x512xi1> to vector<1x512xi1>
    %73 = vector.broadcast %72 : vector<1x512xi1> to vector<8x512xi1>
    %74 = vector.broadcast %71 : bf16 to vector<8x512xbf16>
    %75 = arith.select %73, %68, %74 : vector<8x512xi1>, vector<8x512xbf16>
    %c0_33 = arith.constant 0 : index
    %c0_34 = arith.constant 0 : index
    %c0_35 = arith.constant 0 : index
    %76 = vector.load %arg4[%c0_33, %c0_34, %c0_35] : memref<3x32x8xbf16, #tpu.memory_space<vmem>>, vector<1x32x8xbf16>
    %77 = vector.shape_cast %76 : vector<1x32x8xbf16> to vector<32x8xbf16>
    %cst_36 = arith.constant dense<0.000000e+00> : vector<32x512xf32>
    %78 = tpu.matmul %77, %75, %cst_36 {dimension_numbers = #tpu.dot_dimension_numbers<[1], [0], [0], [1], [0, 0, 1, 1], [], []>} : vector<32x8xbf16>, vector<8x512xbf16>, vector<32x512xf32> -> vector<32x512xf32>
    %c0_37 = arith.constant 0 : index
    %c128_38 = arith.constant 128 : index
    %79 = vector.load %arg10[%c0_37, %c128_38] : memref<8x768xf32, #tpu.memory_space<vmem>>, vector<8x512xf32>
    %80 = arith.truncf %79 : vector<8x512xf32> to vector<8x512xbf16>
    %c1_39 = arith.constant 1 : index
    %c0_40 = arith.constant 0 : index
    %c0_41 = arith.constant 0 : index
    %81 = vector.load %arg4[%c1_39, %c0_40, %c0_41] : memref<3x32x8xbf16, #tpu.memory_space<vmem>>, vector<1x32x8xbf16>
    %82 = vector.shape_cast %81 : vector<1x32x8xbf16> to vector<32x8xbf16>
    %cst_42 = arith.constant dense<0.000000e+00> : vector<32x512xf32>
    %83 = tpu.matmul %82, %80, %cst_42 {dimension_numbers = #tpu.dot_dimension_numbers<[1], [0], [0], [1], [0, 0, 1, 1], [], []>} : vector<32x8xbf16>, vector<8x512xbf16>, vector<32x512xf32> -> vector<32x512xf32>
    %84 = arith.addf %78, %83 : vector<32x512xf32>
    %c0_43 = arith.constant 0 : index
    %c129_44 = arith.constant 129 : index
    %85 = vector.load %arg10[%c0_43, %c129_44] : memref<8x768xf32, #tpu.memory_space<vmem>>, vector<8x512xf32>
    %86 = arith.truncf %85 : vector<8x512xf32> to vector<8x512xbf16>
    %c127_i32_45 = arith.constant 127 : i32
    %87 = vector.broadcast %c127_i32_45 : i32 to vector<1x512xi32>
    %88 = arith.cmpi slt, %16, %87 : vector<1x512xi32>
    %cst_46 = arith.constant 0.000000e+00 : f32
    %89 = arith.truncf %cst_46 : f32 to bf16
    %90 = vector.shape_cast %88 : vector<1x512xi1> to vector<1x512xi1>
    %91 = vector.broadcast %90 : vector<1x512xi1> to vector<8x512xi1>
    %92 = vector.broadcast %89 : bf16 to vector<8x512xbf16>
    %93 = arith.select %91, %86, %92 : vector<8x512xi1>, vector<8x512xbf16>
    %c2_47 = arith.constant 2 : index
    %c0_48 = arith.constant 0 : index
    %c0_49 = arith.constant 0 : index
    %94 = vector.load %arg4[%c2_47, %c0_48, %c0_49] : memref<3x32x8xbf16, #tpu.memory_space<vmem>>, vector<1x32x8xbf16>
    %95 = vector.shape_cast %94 : vector<1x32x8xbf16> to vector<32x8xbf16>
    %cst_50 = arith.constant dense<0.000000e+00> : vector<32x512xf32>
    %96 = tpu.matmul %95, %93, %cst_50 {dimension_numbers = #tpu.dot_dimension_numbers<[1], [0], [0], [1], [0, 0, 1, 1], [], []>} : vector<32x8xbf16>, vector<8x512xbf16>, vector<32x512xf32> -> vector<32x512xf32>
    %97 = arith.addf %84, %96 : vector<32x512xf32>
    %c0_51 = arith.constant 0 : index
    %c0_52 = arith.constant 0 : index
    %98 = vector.load %arg5[%c0_51, %c0_52] : memref<32x1xf32, #tpu.memory_space<vmem>>, vector<32x1xf32>
    %99 = vector.broadcast %98 : vector<32x1xf32> to vector<32x512xf32>
    %100 = arith.addf %97, %99 : vector<32x512xf32>
    %cst_53 = arith.constant 5.000000e-01 : f32
    %101 = vector.broadcast %cst_53 : f32 to vector<32x512xf32>
    %102 = arith.mulf %101, %100 : vector<32x512xf32>
    %cst_54 = arith.constant 4.471500e-02 : f32
    %103 = vector.broadcast %cst_54 : f32 to vector<32x512xf32>
    %104 = arith.mulf %103, %100 : vector<32x512xf32>
    %105 = arith.mulf %104, %100 : vector<32x512xf32>
    %106 = arith.mulf %105, %100 : vector<32x512xf32>
    %107 = arith.addf %100, %106 : vector<32x512xf32>
    %cst_55 = arith.constant 0.797884583 : f32
    %108 = vector.broadcast %cst_55 : f32 to vector<32x512xf32>
    %109 = arith.mulf %108, %107 : vector<32x512xf32>
    %110 = math.tanh %109 : vector<32x512xf32>
    %cst_56 = arith.constant 1.000000e+00 : f32
    %111 = vector.broadcast %cst_56 : f32 to vector<32x512xf32>
    %112 = arith.addf %111, %110 : vector<32x512xf32>
    %113 = arith.mulf %102, %112 : vector<32x512xf32>
    %c0_57 = arith.constant 0 : index
    %c128_58 = arith.constant 128 : index
    %114 = vector.load %arg11[%c0_57, %c128_58] : memref<32x768xf32, #tpu.memory_space<vmem>>, vector<32x512xf32>
    tpu.vector_store %arg11[%c0_57, %c128_58], %113 {strides = array<i32>} : memref<32x768xf32, #tpu.memory_space<vmem>>, vector<32x512xf32>,
    %c0_59 = arith.constant 0 : index
    %c127_60 = arith.constant 127 : index
    %115 = vector.load %arg11[%c0_59, %c127_60] : memref<32x768xf32, #tpu.memory_space<vmem>>, vector<32x512xf32>
    %116 = arith.truncf %115 : vector<32x512xf32> to vector<32x512xbf16>
    %c1_i32_61 = arith.constant 1 : i32
    %117 = vector.broadcast %c1_i32_61 : i32 to vector<1x512xi32>
    %118 = arith.cmpi sge, %16, %117 : vector<1x512xi32>
    %cst_62 = arith.constant 0.000000e+00 : f32
    %119 = arith.truncf %cst_62 : f32 to bf16
    %120 = vector.shape_cast %118 : vector<1x512xi1> to vector<1x512xi1>
    %121 = vector.broadcast %120 : vector<1x512xi1> to vector<32x512xi1>
    %122 = vector.broadcast %119 : bf16 to vector<32x512xbf16>
    %123 = arith.select %121, %116, %122 : vector<32x512xi1>, vector<32x512xbf16>
    %c0_63 = arith.constant 0 : index
    %c0_64 = arith.constant 0 : index
    %c0_65 = arith.constant 0 : index
    %124 = vector.load %arg6[%c0_63, %c0_64, %c0_65] : memref<3x8x32xbf16, #tpu.memory_space<vmem>>, vector<1x8x32xbf16>
    %125 = vector.shape_cast %124 : vector<1x8x32xbf16> to vector<8x32xbf16>
    %cst_66 = arith.constant dense<0.000000e+00> : vector<8x512xf32>
    %126 = tpu.matmul %125, %123, %cst_66 {dimension_numbers = #tpu.dot_dimension_numbers<[1], [0], [0], [1], [0, 0, 1, 1], [], []>} : vector<8x32xbf16>, vector<32x512xbf16>, vector<8x512xf32> -> vector<8x512xf32>
    %c0_67 = arith.constant 0 : index
    %c128_68 = arith.constant 128 : index
    %127 = vector.load %arg11[%c0_67, %c128_68] : memref<32x768xf32, #tpu.memory_space<vmem>>, vector<32x512xf32>
    %128 = arith.truncf %127 : vector<32x512xf32> to vector<32x512xbf16>
    %c1_69 = arith.constant 1 : index
    %c0_70 = arith.constant 0 : index
    %c0_71 = arith.constant 0 : index
    %129 = vector.load %arg6[%c1_69, %c0_70, %c0_71] : memref<3x8x32xbf16, #tpu.memory_space<vmem>>, vector<1x8x32xbf16>
    %130 = vector.shape_cast %129 : vector<1x8x32xbf16> to vector<8x32xbf16>
    %cst_72 = arith.constant dense<0.000000e+00> : vector<8x512xf32>
    %131 = tpu.matmul %130, %128, %cst_72 {dimension_numbers = #tpu.dot_dimension_numbers<[1], [0], [0], [1], [0, 0, 1, 1], [], []>} : vector<8x32xbf16>, vector<32x512xbf16>, vector<8x512xf32> -> vector<8x512xf32>
    %132 = arith.addf %126, %131 : vector<8x512xf32>
    %c0_73 = arith.constant 0 : index
    %c129_74 = arith.constant 129 : index
    %133 = vector.load %arg11[%c0_73, %c129_74] : memref<32x768xf32, #tpu.memory_space<vmem>>, vector<32x512xf32>
    %134 = arith.truncf %133 : vector<32x512xf32> to vector<32x512xbf16>
    %c127_i32_75 = arith.constant 127 : i32
    %135 = vector.broadcast %c127_i32_75 : i32 to vector<1x512xi32>
    %136 = arith.cmpi slt, %16, %135 : vector<1x512xi32>
    %cst_76 = arith.constant 0.000000e+00 : f32
    %137 = arith.truncf %cst_76 : f32 to bf16
    %138 = vector.shape_cast %136 : vector<1x512xi1> to vector<1x512xi1>
    %139 = vector.broadcast %138 : vector<1x512xi1> to vector<32x512xi1>
    %140 = vector.broadcast %137 : bf16 to vector<32x512xbf16>
    %141 = arith.select %139, %134, %140 : vector<32x512xi1>, vector<32x512xbf16>
    %c2_77 = arith.constant 2 : index
    %c0_78 = arith.constant 0 : index
    %c0_79 = arith.constant 0 : index
    %142 = vector.load %arg6[%c2_77, %c0_78, %c0_79] : memref<3x8x32xbf16, #tpu.memory_space<vmem>>, vector<1x8x32xbf16>
    %143 = vector.shape_cast %142 : vector<1x8x32xbf16> to vector<8x32xbf16>
    %cst_80 = arith.constant dense<0.000000e+00> : vector<8x512xf32>
    %144 = tpu.matmul %143, %141, %cst_80 {dimension_numbers = #tpu.dot_dimension_numbers<[1], [0], [0], [1], [0, 0, 1, 1], [], []>} : vector<8x32xbf16>, vector<32x512xbf16>, vector<8x512xf32> -> vector<8x512xf32>
    %145 = arith.addf %132, %144 : vector<8x512xf32>
    %c0_81 = arith.constant 0 : index
    %c0_82 = arith.constant 0 : index
    %146 = vector.load %arg7[%c0_81, %c0_82] : memref<8x1xf32, #tpu.memory_space<vmem>>, vector<8x1xf32>
    %147 = vector.broadcast %146 : vector<8x1xf32> to vector<8x512xf32>
    %148 = arith.addf %145, %147 : vector<8x512xf32>
    %c0_83 = arith.constant 0 : index
    %c128_84 = arith.constant 128 : index
    %149 = vector.load %arg10[%c0_83, %c128_84] : memref<8x768xf32, #tpu.memory_space<vmem>>, vector<8x512xf32>
    %150 = arith.addf %149, %148 : vector<8x512xf32>
    %cst_85 = arith.constant 5.000000e-01 : f32
    %151 = vector.broadcast %cst_85 : f32 to vector<8x512xf32>
    %152 = arith.mulf %151, %150 : vector<8x512xf32>
    %cst_86 = arith.constant 4.471500e-02 : f32
    %153 = vector.broadcast %cst_86 : f32 to vector<8x512xf32>
    %154 = arith.mulf %153, %150 : vector<8x512xf32>
    %155 = arith.mulf %154, %150 : vector<8x512xf32>
    %156 = arith.mulf %155, %150 : vector<8x512xf32>
    %157 = arith.addf %150, %156 : vector<8x512xf32>
    %cst_87 = arith.constant 0.797884583 : f32
    %158 = vector.broadcast %cst_87 : f32 to vector<8x512xf32>
    %159 = arith.mulf %158, %157 : vector<8x512xf32>
    %160 = math.tanh %159 : vector<8x512xf32>
    %cst_88 = arith.constant 1.000000e+00 : f32
    %161 = vector.broadcast %cst_88 : f32 to vector<8x512xf32>
    %162 = arith.addf %161, %160 : vector<8x512xf32>
    %163 = arith.mulf %152, %162 : vector<8x512xf32>
    %c0_89 = arith.constant 0 : index
    %c0_90 = arith.constant 0 : index
    %164 = vector.load %arg8[%c0_89, %c0_90] : memref<8x512xf32, #tpu.memory_space<vmem>>, vector<8x512xf32>
    tpu.vector_store %arg8[%c0_89, %c0_90], %163 {strides = array<i32>} : memref<8x512xf32, #tpu.memory_space<vmem>>, vector<8x512xf32>,
    return
  }
  func.func @transform_0(%arg0: i32) -> (i32, i32) {
    %c0_i32 = arith.constant 0 : i32
    %c0_i32_0 = arith.constant 0 : i32
    return %c0_i32, %arg0 : i32, i32
  }
  func.func @transform_1(%arg0: i32) -> (i32, i32, i32) {
    %c0_i32 = arith.constant 0 : i32
    %c0_i32_0 = arith.constant 0 : i32
    %c0_i32_1 = arith.constant 0 : i32
    %c0_i32_2 = arith.constant 0 : i32
    return %c0_i32, %c0_i32_0, %c0_i32_1 : i32, i32, i32
  }
  func.func @transform_2(%arg0: i32) -> (i32, i32) {
    %c0_i32 = arith.constant 0 : i32
    %c0_i32_0 = arith.constant 0 : i32
    %c0_i32_1 = arith.constant 0 : i32
    return %c0_i32, %c0_i32_0 : i32, i32
  }
  func.func @transform_3(%arg0: i32) -> (i32, i32, i32) {
    %c0_i32 = arith.constant 0 : i32
    %c0_i32_0 = arith.constant 0 : i32
    %c0_i32_1 = arith.constant 0 : i32
    %c0_i32_2 = arith.constant 0 : i32
    return %c0_i32, %c0_i32_0, %c0_i32_1 : i32, i32, i32
  }
  func.func @transform_4(%arg0: i32) -> (i32, i32) {
    %c0_i32 = arith.constant 0 : i32
    %c0_i32_0 = arith.constant 0 : i32
    %c0_i32_1 = arith.constant 0 : i32
    return %c0_i32, %c0_i32_0 : i32, i32
  }
  func.func @transform_5(%arg0: i32) -> (i32, i32, i32) {
    %c0_i32 = arith.constant 0 : i32
    %c0_i32_0 = arith.constant 0 : i32
    %c0_i32_1 = arith.constant 0 : i32
    %c0_i32_2 = arith.constant 0 : i32
    return %c0_i32, %c0_i32_0, %c0_i32_1 : i32, i32, i32
  }
  func.func @transform_6(%arg0: i32) -> (i32, i32) {
    %c0_i32 = arith.constant 0 : i32
    %c0_i32_0 = arith.constant 0 : i32
    %c0_i32_1 = arith.constant 0 : i32
    return %c0_i32, %c0_i32_0 : i32, i32
  }
  func.func @transform_7(%arg0: i32) -> (i32, i32) {
    %c0_i32 = arith.constant 0 : i32
    %c0_i32_0 = arith.constant 0 : i32
    return %c0_i32, %arg0 : i32, i32
  }
}

</mosaic_0001>

<bundles_post_ra>
// kernel: tpu_custom_call.1
= control target key start
LH: loop header
LB: loop body
LE: loop exit
PB: predicated region body
PF: predicated region fallthrough
CT: control target
= control target key end

     0   :  { %12 = vsyncpa [#allocation6], 0  ;;  %s3011_s0 = inlined_call_operand.vmem [shape: f32[4,1024], index: 0, kind: input, shape index: {}]   ;;  %s3012_s1 = inlined_call_operand.vmem [shape: bf16[3,8,4], index: 1, kind: input, shape index: {}]   ;;  %s3013_s2 = inlined_call_operand.vmem [shape: f32[8,1], index: 2, kind: input, shape index: {}]   ;;  %s3014_s3 = inlined_call_operand.vmem [shape: bf16[3,32,8], index: 3, kind: input, shape index: {}]   ;;  %s3015_s4 = inlined_call_operand.vmem [shape: f32[32,1], index: 4, kind: input, shape index: {}]   ;;  %s3016_s5 = inlined_call_operand.vmem [shape: bf16[3,8,32], index: 5, kind: input, shape index: {}]   ;;  %s3017_s6 = inlined_call_operand.vmem [shape: f32[8,1], index: 6, kind: input, shape index: {}]   ;;  %s3018_s7 = inlined_call_operand.hbm [shape: f32[8,1024], index: 7, kind: output, shape index: {}]  }
   0x1   :  { %14 = vsyncpa [#allocation6 + $0x1], 0  ;;  %s2458_s24 = smov 0   ;;  %s2460_s25 = smov 0  }
   0x2   :  { %s2462_s26 = smov 0   ;;  %s2464_s27 = smov 0  }
   0x3 LB: > { %s2479_s28 = sadd.s32 4294967295, %s2412_s27   ;;  %s2149_s29 = sadd.s32 4294967294, %s2412_s27   ;;  %s2412_s27 = sphi %s2464_s27, %s3024_s27   ;;  %s2408_s26 = sphi %s2462_s26, %s3023_s26   ;;  %s2404_s25 = sphi %s2460_s25, %s3022_s25   ;;  %s2400_s24 = sphi %s2458_s24, %s3021_s24  }
   0x4   : > { %s2483_s30 = sadd.s32 1, %s2412_s27   ;;  %s179_s8 = sadd.s32 1, %s2408_s26 }
   0x5   : > { %s176_s9 = ssub.s32 %s2412_s27, %s2483_s30  ;;  %p189_p0 = scmp.ne.s32.totalorder %s2408_s26, %s2404_s25 }
   0x6   : > { %p177_p1 = scmp.eq.s32.totalorder %s176_s9, 0  ;;  %p190_p2 = scmp.eq.s32.totalorder %s2479_s28, 1 }
   0x7   : > { %p195_p3 = scmp.ne.s32.totalorder %s2404_s25, %s2400_s24  ;;  %p196_p4 = scmp.eq.s32.totalorder %s2149_s29, 1 }
   0x8   : > { %s2494_s10 = scalar_select %p177_p1, %s2408_s26, %s179_s8  }
   0x9   : > { %p2496_p5 = por %p190_p2, %p189_p0  ;;  %p2500_p6 = por %p196_p4, %p195_p3 }
   0xa   : > { %p2152_p7 = scmp.ge.s32.totalorder %s2412_s27, 1  ;;  %p241_p8 = scmp.lt.s32.totalorder %s2412_s27, 3 }
   0xc   : > { %p242_p9 = pnand %p2152_p7, %p241_p8 }
   0xd   : > { %v283_v0 = vlaneseq (!%p242_p9)  ;;  %s2154_s13 = sshll.u32 (!%p242_p9), %s2479_s28, 2  ;;  %v2414_v1 = vmov (!%p242_p9), 0   ;;  %s2415_s18 = smov (!%p242_p9), 127   ;;  %vm427_vm12 = vcmask (!%p242_p9), 1041408   ;;  %v2156_v33 = vld [vmem:[%s3012_s1 + $0x4] sm:$0xf] (!%p242_p9) }
   0xe   : > { %245 = sbr.rel (%p242_p9) target bundleno = 1325 (0x52d), region = 48  ;;  %472 = vmatprep.mubr.bf16.mxu0 (!%p242_p9), %v2414_v1  ;;  %513 = vmatprep.mubr.bf16.mxu1 (!%p242_p9), %v2414_v1  ;;  %p274_p10 = scmp.lt.s32.totalorder (!%p242_p9), %s2154_s13, 7  ;;  %vm423_vm13 = vcmask (!%p242_p9), 31744   ;;  %vm394_vm15 = vcmask (!%p242_p9), 1039360  }
   0xf   : > { %v284_v2 = vand.u32 (!%p242_p9), 127, %v283_v0  ;;  %v371_v3 = vshrl.u32 (!%p242_p9), %v283_v0, 7  ;;  %2290 = vset.pattern.permute.xlu0 (!%p242_p9), %v2414_v1  ;;  %2291 = vset.pattern.permute.xlu1 (!%p242_p9), %v2414_v1  ;;  %s2416_s19 = smov (!%p242_p9), 1   ;;  %s270_s16 = sand.u32 (!%p242_p9), 1, %s2404_s25  }
  0x10   : > { %s2215_s20 = sshll.u32 (!%p242_p9), %s2479_s28, 9  ;;  %s2076_s28 = scalar_lea.sflag (!%p242_p9), [#allocation6], %s270_s16 }
  0x11   : > { %v286_v4 = vadd.s32 (!%p242_p9), 256, %v284_v2  ;;  %v287_v5 = vadd.s32 (!%p242_p9), 384, %v284_v2  ;;  %v285_v6 = vadd.s32 (!%p242_p9), 128, %v284_v2  ;;  %v372_v9 = vsub.s32 (!%p242_p9), 0, %v371_v3  ;;  %s2969_s8 = scalar_lea.hbm (!%p242_p9), %s3018_s7, %s2215_s20  ;;  %s2417_s9 = smov (!%p242_p9), [#allocation5]  }
  0x12   : > { %vm354_vm0 = vcmp.ge.s32.totalorder (!%p242_p9), %v284_v2, 1  ;;  %v376_v11 = vsub.s32 (!%p242_p9), 4, %v371_v3  ;;  %vm653_vm3 = vcmp.lt.s32.totalorder (!%p242_p9), %v284_v2, 127  ;;  %v641_v3 = vld [vmem:[#allocation2 + $0x14] sm:$0xf] (!%p242_p9) }
  0x13   : > { %v306_v7 = vand.u32 (!%p242_p9), 127, %v286_v4  ;;  %v313_v8 = vand.u32 (!%p242_p9), 127, %v287_v5  ;;  %v299_v10 = vand.u32 (!%p242_p9), 127, %v285_v6  ;;  %v652_v6 = vpack.c.bf16 (!%p242_p9), %v641_v3, %v641_v3 }
  0x15   : > { %s3026_s13 = smov (!%p274_p10, %s2154_s13), 7  ;;  %vm356_vm1 = vcmp.ge.s32.totalorder %v306_v7, 1  ;;  %vm357_vm2 = vcmp.ge.s32.totalorder %v313_v8, 1  ;;  %vm355_vm5 = vcmp.ge.s32.totalorder %v299_v10, 1  ;;  %vm654_vm6 = vcmp.lt.s32.totalorder %v299_v10, 127 }
  0x16   : > { %s2155_s14 = sshll.u32 %s3026_s13, 2  ;;  %vm367_vm4 = vmpackc.low %vm357_vm2, %vm356_vm1  ;;  %vm655_vm9 = vcmp.lt.s32.totalorder %v306_v7, 127  ;;  %vm656_vm10 = vcmp.lt.s32.totalorder %v313_v8, 127  ;;  %vm537_vm1 = vcmask 7168   ;;  %v828_v7 = vld [vmem:[%s3013_s2] sm:$0xff]  ;;  %v878_v8 = vld [vmem:[#allocation3] sm:$0xff] }
  0x17   : > { %s277_s17 = scalar_lea.vmem %s3011_s0, %s2155_s14  ;;  %v369_v14 = vsel %vm367_vm4, 65537, %v2414_v1  ;;  %vm366_vm7 = vmpackc.low %vm355_vm5, %vm354_vm0  ;;  %v883_v10 = vpack.c.bf16 %v878_v8, %v878_v8 }
  0x18   : > { %v336_v12 = vld [vmem:[%s277_s17] sm:$0xff]  ;;  %v337_v13 = vld [vmem:[%s277_s17 + $0x8] sm:$0xff]  ;;  %v381_v15 = vrot.slane %v369_v14, %v372_v9  ;;  %v368_v16 = vsel %vm366_vm7, 65537, %v2414_v1  ;;  %vm665_vm8 = vmpackc.low %vm654_vm6, %vm653_vm3  ;;  %v385_v18 = vrot.slane %v369_v14, %v376_v11  ;;  %s2153_s17 = sshll.u32 %s270_s16, 5 }
  0x19   : > { %338 = vst [vmem:[#allocation2 + $0x4] sm:$0xff] %v336_v12  ;;  %339 = vst [vmem:[#allocation2 + $0xc] sm:$0xff] %v337_v13  ;;  %v373_v17 = vrot.slane %v368_v16, %v372_v9  ;;  %v377_v19 = vrot.slane %v368_v16, %v376_v11  ;;  %v667_v20 = vsel %vm665_vm8, 65537, %v2414_v1  ;;  %v644_v26 = vcombine.high %v336_v12, %v336_v12  ;;  %s272_s21 = scalar_lea.vmem [#allocation5], %s2153_s17 }
  0x1a   : > { %390 = vrot.lane.b32.xlu1 %v381_v15, %s2415_s18  ;;  %vm666_vm11 = vmpackc.low %vm656_vm10, %vm655_vm9  ;;  %v676_v21 = vrot.slane %v667_v20, %v376_v11  ;;  %v672_v22 = vrot.slane %v667_v20, %v372_v9  ;;  %v645_v27 = vcombine.high %v337_v13, %v337_v13  ;;  %v648_v28 = vpack.c.bf16 %v336_v12, %v336_v12  ;;  %v408_v20 = vld [vmem:[%s3012_s1] sm:$0xf]  ;;  %s2090_s22 = sshll.u32 %s272_s21, 4  ;;  %s2971_s22 = int_to_ptr.vmem [resolvable:$true] %s2090_s22 }
  0x1b   : > { %386 = vrot.lane.b32.xlu0 %v373_v17, %s2415_s18  ;;  %v668_v23 = vsel %vm666_vm11, 65537, %v2414_v1  ;;  %v649_v29 = vpack.c.bf16 %v644_v26, %v644_v26  ;;  %v650_v32 = vpack.c.bf16 %v337_v13, %v337_v13  ;;  %vm919_vm10 = vcmask 1043456  }
  0x1c   : > { %v684_v24 = vrot.slane %v668_v23, %v376_v11  ;;  %v680_v25 = vrot.slane %v668_v23, %v372_v9  ;;  %v651_v30 = vpack.c.bf16 %v645_v27, %v645_v27  ;;  %v429_v31 = vsel %vm427_vm12, %v648_v28, 0 }
  0x1d   : > { %2157 = vmatprep.subr.msk.bf16.mxu0 %vm427_vm12, %v649_v29  ;;  %v435_v34 = vsel %vm427_vm12, %v650_v32, 0  ;;  %vm912_vm11 = vcmask 64512  }
  0x1e   : > { %392 = vrot.lane.b32.xlu1 %v385_v18, %s2415_s18  ;;  %2159 = vmatprep.subr.msk.bf16.mxu1 %vm427_vm12, %v651_v30 }
  0x1f   : > { %388 = vrot.lane.b32.xlu0 %v377_v19, %s2415_s18  ;;  %441 = vmatpush1.bf16.msra.mxu0 %v429_v31 }
  0x20   : > { %482 = vmatpush1.bf16.msra.mxu1 %v435_v34  ;;  %v340_v35 = vld [vmem:[#allocation2] sm:$0xff]  ;;  %v342_v37 = vld [vmem:[#allocation2 + $0x10] sm:$0xf]  ;;  %v341_v46 = vld [vmem:[#allocation2 + $0x8] sm:$0xff] }
  0x21   : > { %v349_v36 = vpack.c.bf16 %v340_v35, %v340_v35  ;;  %v353_v40 = vpack.c.bf16 %v342_v37, %v342_v37  ;;  %v351_v47 = vpack.c.bf16 %v341_v46, %v341_v46  ;;  %v345_v48 = vcombine.high %v340_v35, %v340_v35 }
  0x22   : > { %687 = vrot.lane.b32.xlu1 %v676_v21, %s2416_s19  ;;  %2158 = vmatmul.mubr.msk.bf16.vlgmr.msra.gmra.mrb[0].mxu0 %vm423_vm13, %v2156_v33  ;;  %v346_v53 = vcombine.high %v341_v46, %v341_v46 }
  0x23   : > { %685 = vrot.lane.b32.xlu0 %v672_v22, %s2416_s19  ;;  %589 = vmatprep.mubr.bf16.mxu0 %v2414_v1  ;;  %v350_v56 = vpack.c.bf16 %v345_v48, %v345_v48 }
  0x24   : > { %2160 = vmatmul.mubr.msk.bf16.vlgmr.msra.gmra.mrb[0].mxu1 %vm423_vm13, %v2156_v33  ;;  %v352_v61 = vpack.c.bf16 %v346_v53, %v346_v53 }
  0x25   : > { %630 = vmatprep.mubr.bf16.mxu1 %v2414_v1 }
  0x26   : > { %691 = vrot.lane.b32.xlu1 %v684_v24, %s2416_s19 }
  0x27   : > { %689 = vrot.lane.b32.xlu0 %v680_v25, %s2416_s19 }
  0x8c   : > { %v391_v38 = vpop.permute.xlu1 %390 }
  0x8d   : > { %v2537_v39 = vpop.permute.xlu0 %386 }
  0x8e   : > { %vm398_vm14 = vcmp.ne.s16.totalorder %v2537_v39, 0 }
  0x8f   : > { %v403_v41 = vsel %vm398_vm14, %v349_v36, 0  ;;  %v888_v11 = vsel %vm398_vm14, %v883_v10, 0 }
  0x90   : > { %527 = vrot.lane.b32.xlu0 %v403_v41, %s2416_s19  ;;  %v2543_v42 = vpop.permute.xlu1 %392 }
  0x91   : > { %vm402_vm0 = vcmp.ne.s16.totalorder %v2543_v42, 0  ;;  %v389_v43 = vpop.permute.xlu0 %388  ;;  %v2576_v58 = vsel %vm394_vm15, %v391_v38, %v2543_v42 }
  0x92   : > { %v2547_v44 = vsel %vm394_vm15, %v389_v43, %v391_v38  ;;  %v407_v45 = vsel %vm402_vm0, %v353_v40, 0  ;;  %v2555_v50 = vsel %vm394_vm15, %v2537_v39, %v389_v43  ;;  %vm401_vm7 = vcmp.ne.s16.totalorder %v2576_v58, 0  ;;  %v2298_v39 = vld [vmem:[%s3014_s3] sm:$0xff]  }
  0x93   : > { %vm400_vm2 = vcmp.ne.s16.totalorder %v2547_v44, 0  ;;  %vm399_vm4 = vcmp.ne.s16.totalorder %v2555_v50, 0  ;;  %v406_v4 = vsel %vm401_vm7, %v352_v61, 0  ;;  %v1859_v44 = vld [vmem:[#allocation4 + $0xb8] sm:$0xff] }
  0x94   : > { %535 = vrot.lane.b32.xlu0 %v407_v45, %s2416_s19  ;;  %v688_v49 = vpop.permute.xlu1 %687  ;;  %v405_v55 = vsel %vm400_vm2, %v351_v47, 0  ;;  %v404_v63 = vsel %vm399_vm4, %v350_v56, 0 }
  0x95   : > { %v2557_v51 = vpop.permute.xlu0 %685 }
  0x96   : > { %v2561_v52 = vsel %vm537_vm1, %v2557_v51, %v688_v49  ;;  %vm696_vm3 = vcmp.ne.s16.totalorder %v2557_v51, 0 }
  0x97   : > { %v701_v54 = vsel %vm696_vm3, %v648_v28, 0  ;;  %vm697_vm5 = vcmp.ne.s16.totalorder %v2561_v52, 0 }
  0x98   : > { %713 = vrot.lane.b32.xlu1 %v701_v54, %s2415_s18  ;;  %531 = vrot.lane.b32.xlu0 %v405_v55, %s2416_s19  ;;  %v2572_v57 = vpop.permute.xlu1 %691  ;;  %v702_v62 = vsel %vm697_vm5, %v649_v29, 0 }
  0x99   : > { %v690_v59 = vpop.permute.xlu0 %689  ;;  %vm700_vm9 = vcmp.ne.s16.totalorder %v2572_v57, 0 }
  0x9a   : > { %v2580_v60 = vsel %vm537_vm1, %v690_v59, %v2572_v57  ;;  %v2587_v0 = vsel %vm537_vm1, %v688_v49, %v690_v59  ;;  %v705_v9 = vsel %vm700_vm9, %v652_v6, 0 }
  0x9b   : > { %vm699_vm6 = vcmp.ne.s16.totalorder %v2580_v60, 0  ;;  %vm698_vm8 = vcmp.ne.s16.totalorder %v2587_v0, 0  ;;  %v2017_v0 = vld [vmem:[%s3017_s6] sm:$0xff] }
  0x9c   : > { %715 = vrot.lane.b32.xlu0 %v702_v62, %s2415_s18  ;;  %529 = vrot.lane.b32.xlu1 %v404_v63, %s2416_s19  ;;  %v704_v2 = vsel %vm699_vm6, %v651_v30, 0  ;;  %v703_v5 = vsel %vm698_vm8, %v650_v32, 0  ;;  %v2165_v32 = vld [vmem:[%s3012_s1 + $0x8] sm:$0xf] }
  0xa0   : > { %533 = vrot.lane.b32.xlu1 %v406_v4, %s2416_s19  ;;  %719 = vrot.lane.b32.xlu0 %v704_v2, %s2415_s18 }
  0xa4   : > { %717 = vrot.lane.b32.xlu1 %v703_v5, %s2415_s18  ;;  %831 = vperm.xlu0 %2290, %v828_v7  }
  0xa8   : > { %721 = vrot.lane.b32.xlu1 %v705_v9, %s2415_s18 }
  0xac   : > { %1053 = vrot.lane.b32.xlu1 %v888_v11, %s2416_s19 }
  0xf5   : > { %v474_v36 = vpop.f32.mrb[0].mxu0 }
  0xf6   : > { %v476_v37 = vpop.f32.mrb[1].mxu0 }
  0xf7   : > { %v478_v38 = vpop.f32.mrb[2].mxu0  ;;  %v515_v41 = vpop.f32.mrb[0].mxu1 }
  0xf8   : > { %v479_v40 = vpop.f32.mrb[3].mxu0  ;;  %v517_v43 = vpop.f32.mrb[1].mxu1 }
  0xf9   : > { %v519_v45 = vpop.f32.mrb[2].mxu1 }
  0xfa   : > { %v520_v46 = vpop.f32.mrb[3].mxu1 }
 0x102   : > { %v528_v12 = vpop.permute.xlu0 %527 }
 0x106   : > { %v536_v13 = vpop.permute.xlu0 %535 }
 0x10a   : > { %v714_v14 = vpop.permute.xlu1 %713  ;;  %v532_v15 = vpop.permute.xlu0 %531 }
 0x10e   : > { %v530_v16 = vpop.permute.xlu1 %529  ;;  %v716_v21 = vpop.permute.xlu0 %715 }
 0x10f   : > { %v538_v17 = vsel %vm537_vm1, %v528_v12, %v530_v16  ;;  %v539_v18 = vsel %vm537_vm1, %v530_v16, %v532_v15  ;;  %v723_v26 = vsel %vm394_vm15, %v714_v14, %v716_v21 }
 0x110   : > { %v546_v19 = vsel %vm427_vm12, %v538_v17, 0  ;;  %2161 = vmatprep.subr.msk.bf16.mxu0 %vm427_vm12, %v539_v18  ;;  %v731_v30 = vsel %vm427_vm12, %v723_v26, 0 }
 0x111   : > { %558 = vmatpush1.bf16.msra.mxu0 %v546_v19 }
 0x112   : > { %v534_v22 = vpop.permute.xlu1 %533  ;;  %v720_v27 = vpop.permute.xlu0 %719 }
 0x113   : > { %v540_v23 = vsel %vm537_vm1, %v532_v15, %v534_v22  ;;  %v541_v24 = vsel %vm537_vm1, %v534_v22, %v536_v13 }
 0x114   : > { %v552_v25 = vsel %vm427_vm12, %v540_v23, 0  ;;  %2162 = vmatmul.mubr.msk.bf16.vlgmr.msra.gmra.mrb[4].mxu0 %vm423_vm13, %v408_v20  ;;  %2163 = vmatprep.subr.msk.bf16.mxu1 %vm427_vm12, %v541_v24 }
 0x115   : > { %599 = vmatpush1.bf16.msra.mxu1 %v552_v25  ;;  %774 = vmatprep.mubr.bf16.mxu0 %v2414_v1 }
 0x116   : > { %v718_v28 = vpop.permute.xlu1 %717 }
 0x117   : > { %v724_v29 = vsel %vm394_vm15, %v716_v21, %v718_v28  ;;  %v725_v31 = vsel %vm394_vm15, %v718_v28, %v720_v27 }
 0x118   : > { %2164 = vmatmul.mubr.msk.bf16.vlgmr.msra.gmra.mrb[4].mxu1 %vm423_vm13, %v408_v20  ;;  %2166 = vmatprep.subr.msk.bf16.mxu0 %vm427_vm12, %v724_v29  ;;  %v737_v35 = vsel %vm427_vm12, %v725_v31, 0 }
 0x119   : > { %743 = vmatpush1.bf16.msra.mxu0 %v731_v30  ;;  %815 = vmatprep.mubr.bf16.mxu1 %v2414_v1 }
 0x11a   : > { %v722_v33 = vpop.permute.xlu1 %721 }
 0x11b   : > { %v726_v34 = vsel %vm394_vm15, %v720_v27, %v722_v33 }
 0x11c   : > { %2167 = vmatmul.mubr.msk.bf16.vlgmr.msra.gmra.mrb[8].mxu0 %vm423_vm13, %v2165_v32  ;;  %2168 = vmatprep.subr.msk.bf16.mxu1 %vm427_vm12, %v726_v34  ;;  %vm1623_vm12 = vcmask 261120  }
 0x11d   : > { %784 = vmatpush1.bf16.msra.mxu1 %v737_v35  ;;  %964 = vmatprep.mubr.bf16.mxu0 %v2414_v1 }
 0x120   : > { %2169 = vmatmul.mubr.msk.bf16.vlgmr.msra.gmra.mrb[8].mxu1 %vm423_vm13, %v2165_v32 }
 0x121   : > { %1017 = vmatprep.mubr.bf16.mxu1 %v2414_v1 }
 0x123   : > { %v832_v4 = vpop.permute.xlu0 %831 }
 0x1e7   : > { %v591_v47 = vpop.f32.mrb[4].mxu0 }
 0x1e8   : > { %v592_v48 = vadd.f32 %v591_v47, %v474_v36  ;;  %v593_v49 = vpop.f32.mrb[5].mxu0 }
 0x1e9   : > { %v594_v53 = vadd.f32 %v593_v49, %v476_v37  ;;  %v595_v54 = vpop.f32.mrb[6].mxu0 }
 0x1ea   : > { %v596_v55 = vpop.f32.mrb[7].mxu0 }
 0x1eb   : > { %v632_v56 = vpop.f32.mrb[4].mxu1 }
 0x1ec   : > { %v633_v59 = vadd.f32 %v632_v56, %v515_v41  ;;  %v634_v61 = vpop.f32.mrb[5].mxu1 }
 0x1ed   : > { %v635_v62 = vadd.f32 %v634_v61, %v517_v43  ;;  %v636_v63 = vpop.f32.mrb[6].mxu1 }
 0x1ee   : > { %v637_v2 = vpop.f32.mrb[7].mxu1 }
 0x1ef   : > { %v776_v3 = vpop.f32.mrb[8].mxu0 }
 0x1f0   : > { %v824_v5 = vadd.f32 %v776_v3, %v592_v48  ;;  %v778_v6 = vpop.f32.mrb[9].mxu0 }
 0x1f1   : > { %v825_v7 = vadd.f32 %v778_v6, %v594_v53  ;;  %v780_v8 = vpop.f32.mrb[10].mxu0 }
 0x1f2   : > { %v834_v9 = vadd.f32 %v832_v4, %v824_v5  ;;  %v781_v10 = vpop.f32.mrb[11].mxu0 }
 0x1f3   : > { %v835_v11 = vadd.f32 %v832_v4, %v825_v7  ;;  %v817_v12 = vpop.f32.mrb[8].mxu1  ;;  %v2296_v10 = vld [vmem:[%s3014_s3 + $0x10] sm:$0xff]  }
 0x1f4   : > { %v842_v13 = vmul.f32 0.044715, %v834_v9  ;;  %v826_v14 = vadd.f32 %v817_v12, %v633_v59  ;;  %v819_v15 = vpop.f32.mrb[9].mxu1  ;;  %v838_v45 = vmul.f32 0.5, %v834_v9 }
 0x1f5   : > { %v843_v16 = vmul.f32 0.044715, %v835_v11  ;;  %v827_v17 = vadd.f32 %v819_v15, %v635_v62  ;;  %v821_v18 = vpop.f32.mrb[10].mxu1  ;;  %v839_v47 = vmul.f32 0.5, %v835_v11 }
 0x1f6   : > { %v846_v19 = vmul.f32 %v842_v13, %v834_v9  ;;  %v836_v20 = vadd.f32 %v832_v4, %v826_v14  ;;  %v822_v21 = vpop.f32.mrb[11].mxu1 }
 0x1f7   : > { %v847_v22 = vmul.f32 %v843_v16, %v835_v11  ;;  %v837_v23 = vadd.f32 %v832_v4, %v827_v17  ;;  %v1195_v16 = vld [vmem:[#allocation3 + $0x28] sm:$0xff]  ;;  %v2297_v17 = vld [vmem:[%s3014_s3 + $0x18] sm:$0xff]  }
 0x1f8   : > { %v850_v24 = vmul.f32 %v846_v19, %v834_v9  ;;  %v844_v25 = vmul.f32 0.044715, %v836_v20  ;;  %v840_v56 = vmul.f32 0.5, %v836_v20  ;;  %v1200_v19 = vpack.c.bf16 %v1195_v16, %v1195_v16  ;;  %v1380_v21 = vld [vmem:[%s3015_s4] sm:$0xff] }
 0x1f9   : > { %v851_v26 = vmul.f32 %v847_v22, %v835_v11  ;;  %v845_v27 = vmul.f32 0.044715, %v837_v23  ;;  %v841_v62 = vmul.f32 0.5, %v837_v23 }
 0x1fa   : > { %v854_v28 = vadd.f32 %v850_v24, %v834_v9  ;;  %v848_v29 = vmul.f32 %v844_v25, %v836_v20  ;;  %v1205_v22 = vsel %vm700_vm9, %v1200_v19, 0  ;;  %v1580_v24 = vld [vmem:[#allocation4] sm:$0xff]  ;;  %v1585_v25 = vld [vmem:[#allocation4 + $0x30] sm:$0xff] }
 0x1fb   : > { %v855_v30 = vadd.f32 %v851_v26, %v835_v11  ;;  %v849_v31 = vmul.f32 %v845_v27, %v837_v23  ;;  %v1382_v26 = vld [vmem:[%s3015_s4 + $0x10] sm:$0xff]  ;;  %v1600_v27 = vpack.c.bf16 %v1585_v25, %v1580_v24 }
 0x1fc   : > { %v858_v32 = vmul.f32 0.7978846, %v854_v28  ;;  %v852_v33 = vmul.f32 %v848_v29, %v836_v20  ;;  %v1590_v28 = vld [vmem:[#allocation4 + $0x60] sm:$0xff]  ;;  %v1595_v29 = vld [vmem:[#allocation4 + $0x90] sm:$0xff] }
 0x1fd   : > { %v859_v34 = vmul.f32 0.7978846, %v855_v30  ;;  %v853_v35 = vmul.f32 %v849_v31, %v837_v23  ;;  %v1383_v30 = vld [vmem:[%s3015_s4 + $0x18] sm:$0xff]  ;;  %v1605_v31 = vpack.c.bf16 %v1595_v29, %v1590_v28 }
 0x1fe   : > { %2302 = vtanh.f32 %v858_v32  ;;  %v856_v36 = vadd.f32 %v852_v33, %v836_v20  ;;  %v1610_v32 = vsel %vm398_vm14, %v1600_v27, 0  ;;  %v1844_v33 = vld [vmem:[#allocation4 + $0x28] sm:$0xff] }
 0x1ff   : > { %2304 = vtanh.f32 %v859_v34  ;;  %v857_v37 = vadd.f32 %v853_v35, %v837_v23  ;;  %v1381_v23 = vld [vmem:[%s3015_s4 + $0x8] sm:$0xff]  ;;  %v1849_v34 = vld [vmem:[#allocation4 + $0x58] sm:$0xff]  ;;  %v1615_v35 = vsel %vm398_vm14, %v1605_v31, 0 }
 0x200   : > { %v860_v38 = vmul.f32 0.7978846, %v856_v36  ;;  %v1864_v36 = vpack.c.bf16 %v1849_v34, %v1844_v33 }
 0x201   : > { %v861_v40 = vmul.f32 0.7978846, %v857_v37 }
 0x202   : > { %2306 = vtanh.f32 %v860_v38  ;;  %v1874_v37 = vsel %vm700_vm9, %v1864_v36, 0  ;;  %v1054_v38 = vpop.permute.xlu1 %1053 }
 0x203   : > { %2308 = vtanh.f32 %v861_v40 }
 0x208   : > { %v2303_v41 = vpop.eup %2302 }
 0x209   : > { %v2305_v43 = vpop.eup %2304  ;;  %v866_v46 = vadd.f32 1.0, %v2303_v41 }
 0x20a   : > { %v867_v48 = vadd.f32 1.0, %v2305_v43 }
 0x20b   : > { %v870_v49 = vmul.f32 %v866_v46, %v838_v45 }
 0x20c   : > { %v2307_v53 = vpop.eup %2306  ;;  %v871_v54 = vmul.f32 %v867_v48, %v839_v47 }
 0x20d   : > { %v2309_v55 = vpop.eup %2308  ;;  %874 = vst [vmem:[#allocation3 + $0x8] sm:$0xff] %v870_v49  ;;  %v868_v59 = vadd.f32 1.0, %v2307_v53  ;;  %v884_v61 = vpack.c.bf16 %v870_v49, %v870_v49 }
 0x20e   : > { %875 = vst [vmem:[#allocation3 + $0x10] sm:$0xff] %v871_v54  ;;  %v869_v63 = vadd.f32 1.0, %v2309_v55  ;;  %v885_v2 = vpack.c.bf16 %v871_v54, %v871_v54 }
 0x20f   : > { %v872_v3 = vmul.f32 %v868_v59, %v840_v56  ;;  %v889_v4 = vsel %vm399_vm4, %v884_v61, 0  ;;  %v921_v5 = vsel %vm919_vm10, %v884_v61, 0  ;;  %v1201_v14 = vsel %vm696_vm3, %v884_v61, 0  ;;  %v2299_v59 = vld [vmem:[%s3014_s3 + $0x8] sm:$0xff]  }
 0x210   : > { %v873_v6 = vmul.f32 %v869_v63, %v841_v62  ;;  %1055 = vrot.lane.b32.xlu1 %v889_v4, %s2416_s19  ;;  %2176 = vmatprep.subr.msk.bf16.mxu0 %vm919_vm10, %v885_v2  ;;  %v890_v7 = vsel %vm400_vm2, %v885_v2, 0  ;;  %v1202_v15 = vsel %vm697_vm5, %v885_v2, 0 }
 0x211   : > { %876 = vst [vmem:[#allocation3 + $0x18] sm:$0xff] %v872_v3  ;;  %933 = vmatpush1.bf16.msra.mxu0 %v921_v5  ;;  %1057 = vrot.lane.b32.xlu0 %v890_v7, %s2416_s19  ;;  %v886_v8 = vpack.c.bf16 %v872_v3, %v872_v3 }
 0x212   : > { %877 = vst [vmem:[#allocation3 + $0x20] sm:$0xff] %v873_v6  ;;  %v887_v9 = vpack.c.bf16 %v873_v6, %v873_v6 }
 0x213   : > { %v891_v11 = vsel %vm401_vm7, %v886_v8, 0  ;;  %v927_v12 = vsel %vm919_vm10, %v886_v8, 0  ;;  %v1203_v18 = vsel %vm698_vm8, %v886_v8, 0  ;;  %v2300_v8 = vld [vmem:[%s3014_s3 + $0x20] sm:$0xff]  }
 0x214   : > { %1059 = vrot.lane.b32.xlu1 %v891_v11, %s2416_s19  ;;  %2179 = vmatprep.subr.msk.bf16.mxu1 %vm919_vm10, %v887_v9  ;;  %v892_v13 = vsel %vm402_vm0, %v887_v9, 0  ;;  %v1204_v20 = vsel %vm699_vm6, %v887_v9, 0  ;;  %v2301_v9 = vld [vmem:[%s3014_s3 + $0x28] sm:$0xff]  }
 0x215   : > { %986 = vmatpush1.bf16.msra.mxu1 %v927_v12  ;;  %1061 = vrot.lane.b32.xlu0 %v892_v13, %s2416_s19 }
 0x216   : > { %2177 = vmatmul.mubr.msk.bf16.vlgmr.msra.gmra.mrb[12].mxu0 %vm912_vm11, %v2296_v10 }
 0x217   : > { %974 = vmatprep.mubr.bf16.mxu0 %v2414_v1 }
 0x218   : > { %1226 = vrot.lane.b32.xlu1 %v1201_v14, %s2415_s18  ;;  %2180 = vmatmul.mubr.msk.bf16.vlgmr.msra.gmra.mrb[12].mxu1 %vm912_vm11, %v2296_v10 }
 0x219   : > { %1228 = vrot.lane.b32.xlu0 %v1202_v15, %s2415_s18  ;;  %1027 = vmatprep.mubr.bf16.mxu1 %v2414_v1 }
 0x21c   : > { %1230 = vrot.lane.b32.xlu1 %v1203_v18, %s2415_s18 }
 0x21d   : > { %1232 = vrot.lane.b32.xlu0 %v1204_v20, %s2415_s18 }
 0x21e   : > { %2178 = vmatmul.mubr.msk.bf16.gmra.mrb[16].mxu0 %vm912_vm11, %v2297_v17 }
 0x21f   : > { %1117 = vmatprep.mubr.bf16.mxu0 %v2414_v1 }
 0x220   : > { %1234 = vrot.lane.b32.xlu1 %v1205_v22, %s2415_s18  ;;  %2181 = vmatmul.mubr.msk.bf16.gmra.mrb[16].mxu1 %vm912_vm11, %v2297_v17 }
 0x221   : > { %1386 = vperm.xlu0 %2290, %v1380_v21   ;;  %1170 = vmatprep.mubr.bf16.mxu1 %v2414_v1 }
 0x224   : > { %1391 = vperm.xlu1 %2291, %v1381_v23  }
 0x225   : > { %1396 = vperm.xlu0 %2290, %v1382_v26  }
 0x228   : > { %1401 = vperm.xlu1 %2291, %v1383_v30  }
 0x229   : > { %1719 = vrot.lane.b32.xlu0 %v1610_v32, %s2416_s19 }
 0x22c   : > { %1729 = vrot.lane.b32.xlu1 %v1615_v35, %s2416_s19 }
 0x230   : > { %1900 = vrot.lane.b32.xlu1 %v1874_v37, %s2415_s18 }
 0x282   : > { %v1056_v40 = vpop.permute.xlu1 %1055 }
 0x283   : > { %v1063_v41 = vsel %vm537_vm1, %v1054_v38, %v1056_v40  ;;  %v1058_v43 = vpop.permute.xlu0 %1057 }
 0x284   : > { %v1074_v45 = vsel %vm919_vm10, %v1063_v41, 0  ;;  %v1064_v46 = vsel %vm537_vm1, %v1056_v40, %v1058_v43 }
 0x285   : > { %2184 = vmatprep.subr.msk.bf16.mxu0 %vm919_vm10, %v1064_v46 }
 0x286   : > { %1086 = vmatpush1.bf16.msra.mxu0 %v1074_v45  ;;  %v1060_v47 = vpop.permute.xlu1 %1059 }
 0x287   : > { %v1065_v48 = vsel %vm537_vm1, %v1058_v43, %v1060_v47  ;;  %v1062_v49 = vpop.permute.xlu0 %1061 }
 0x288   : > { %v1080_v53 = vsel %vm919_vm10, %v1065_v48, 0  ;;  %v1066_v54 = vsel %vm537_vm1, %v1060_v47, %v1062_v49 }
 0x289   : > { %2185 = vmatmul.mubr.msk.bf16.vlgmr.msra.gmra.mrb[12].mxu0 %vm912_vm11, %v2298_v39  ;;  %2187 = vmatprep.subr.msk.bf16.mxu1 %vm919_vm10, %v1066_v54 }
 0x28a   : > { %1139 = vmatpush1.bf16.msra.mxu1 %v1080_v53  ;;  %v1227_v55 = vpop.permute.xlu1 %1226  ;;  %1127 = vmatprep.mubr.bf16.mxu0 %v2414_v1 }
 0x28b   : > { %v1229_v56 = vpop.permute.xlu0 %1228 }
 0x28c   : > { %v1236_v61 = vsel %vm394_vm15, %v1227_v55, %v1229_v56 }
 0x28d   : > { %2188 = vmatmul.mubr.msk.bf16.vlgmr.msra.gmra.mrb[12].mxu1 %vm912_vm11, %v2298_v39  ;;  %v1247_v3 = vsel %vm919_vm10, %v1236_v61, 0 }
 0x28e   : > { %v1231_v62 = vpop.permute.xlu1 %1230  ;;  %1180 = vmatprep.mubr.bf16.mxu1 %v2414_v1 }
 0x28f   : > { %v1237_v63 = vsel %vm394_vm15, %v1229_v56, %v1231_v62  ;;  %v1233_v2 = vpop.permute.xlu0 %1232 }
 0x290   : > { %2196 = vmatprep.subr.msk.bf16.mxu0 %vm919_vm10, %v1237_v63  ;;  %v1238_v4 = vsel %vm394_vm15, %v1231_v62, %v1233_v2 }
 0x291   : > { %2186 = vmatmul.mubr.msk.bf16.gmra.mrb[16].mxu0 %vm912_vm11, %v2299_v59  ;;  %v1253_v7 = vsel %vm919_vm10, %v1238_v4, 0 }
 0x292   : > { %1259 = vmatpush1.bf16.msra.mxu0 %v1247_v3  ;;  %v1235_v5 = vpop.permute.xlu1 %1234  ;;  %1290 = vmatprep.mubr.bf16.mxu0 %v2414_v1 }
 0x293   : > { %v1239_v6 = vsel %vm394_vm15, %v1233_v2, %v1235_v5 }
 0x294   : > { %2199 = vmatprep.subr.msk.bf16.mxu1 %vm919_vm10, %v1239_v6 }
 0x295   : > { %2189 = vmatmul.mubr.msk.bf16.gmra.mrb[16].mxu1 %vm912_vm11, %v2299_v59 }
 0x296   : > { %1312 = vmatpush1.bf16.msra.mxu1 %v1253_v7  ;;  %1343 = vmatprep.mubr.bf16.mxu1 %v2414_v1 }
 0x299   : > { %2197 = vmatmul.mubr.msk.bf16.vlgmr.msra.gmra.mrb[12].mxu0 %vm912_vm11, %v2300_v8 }
 0x29a   : > { %1300 = vmatprep.mubr.bf16.mxu0 %v2414_v1 }
 0x29d   : > { %2200 = vmatmul.mubr.msk.bf16.vlgmr.msra.gmra.mrb[12].mxu1 %vm912_vm11, %v2300_v8 }
 0x29e   : > { %1353 = vmatprep.mubr.bf16.mxu1 %v2414_v1 }
 0x2a0   : > { %v1387_v10 = vpop.permute.xlu0 %1386 }
 0x2a1   : > { %2198 = vmatmul.mubr.msk.bf16.gmra.mrb[16].mxu0 %vm912_vm11, %v2301_v9 }
 0x2a2   : > { %1659 = vmatprep.mubr.bf16.mxu0 %v2414_v1 }
 0x2a3   : > { %v1392_v14 = vpop.permute.xlu1 %1391 }
 0x2a4   : > { %v1397_v8 = vpop.permute.xlu0 %1396 }
 0x2a5   : > { %2201 = vmatmul.mubr.msk.bf16.gmra.mrb[16].mxu1 %vm912_vm11, %v2301_v9 }
 0x2a6   : > { %1700 = vmatprep.mubr.bf16.mxu1 %v2414_v1 }
 0x2a8   : > { %v1720_v60 = vpop.permute.xlu0 %1719 }
 0x36c   : > { %v1292_v11 = vpop.f32.mrb[12].mxu0 }
 0x36d   : > { %v1404_v12 = vadd.f32 %v1387_v10, %v1292_v11  ;;  %v1294_v13 = vpop.f32.mrb[13].mxu0 }
 0x36e   : > { %v2753_v15 = vadd.f32 %v1387_v10, %v1294_v13  ;;  %v1296_v16 = vpop.f32.mrb[14].mxu0 }
 0x36f   : > { %v1436_v17 = vmul.f32 0.044715, %v1404_v12  ;;  %v2755_v18 = vadd.f32 %v1392_v14, %v1296_v16  ;;  %v1298_v19 = vpop.f32.mrb[15].mxu0  ;;  %v1420_v4 = vmul.f32 0.5, %v1404_v12 }
 0x370   : > { %v1437_v20 = vmul.f32 0.044715, %v2753_v15  ;;  %v2758_v21 = vadd.f32 %v1392_v14, %v1298_v19  ;;  %v1345_v22 = vpop.f32.mrb[12].mxu1 }
 0x371   : > { %v1452_v23 = vmul.f32 %v1436_v17, %v1404_v12  ;;  %v1440_v24 = vmul.f32 0.044715, %v2755_v18  ;;  %v2761_v25 = vadd.f32 %v1387_v10, %v1345_v22  ;;  %v1347_v26 = vpop.f32.mrb[13].mxu1 }
 0x372   : > { %v1453_v27 = vmul.f32 %v1437_v20, %v2753_v15  ;;  %v1441_v28 = vmul.f32 0.044715, %v2758_v21  ;;  %v2765_v29 = vadd.f32 %v1387_v10, %v1347_v26  ;;  %v1349_v30 = vpop.f32.mrb[14].mxu1 }
 0x373   : > { %v1468_v31 = vmul.f32 %v1452_v23, %v1404_v12  ;;  %v1456_v32 = vmul.f32 %v1440_v24, %v2755_v18  ;;  %v1438_v33 = vmul.f32 0.044715, %v2761_v25  ;;  %v1351_v34 = vpop.f32.mrb[15].mxu1  ;;  %v2774_v45 = vadd.f32 %v1392_v14, %v1349_v30 }
 0x374   : > { %v1469_v35 = vmul.f32 %v1453_v27, %v2753_v15  ;;  %v1457_v36 = vmul.f32 %v1441_v28, %v2758_v21  ;;  %v1439_v37 = vmul.f32 0.044715, %v2765_v29  ;;  %v1302_v38 = vpop.f32.mrb[16].mxu0  ;;  %v2781_v56 = vadd.f32 %v1392_v14, %v1351_v34  ;;  %v2802_v27 = vpop.permute.xlu1 %1401 }
 0x375   : > { %v1484_v40 = vadd.f32 %v1468_v31, %v1404_v12  ;;  %v1472_v41 = vmul.f32 %v1456_v32, %v2755_v18  ;;  %v1454_v43 = vmul.f32 %v1438_v33, %v2761_v25  ;;  %v1304_v46 = vpop.f32.mrb[17].mxu0  ;;  %v1442_v2 = vmul.f32 0.044715, %v2774_v45 }
 0x376   : > { %v1485_v39 = vadd.f32 %v1469_v35, %v2753_v15  ;;  %v1473_v47 = vmul.f32 %v1457_v36, %v2758_v21  ;;  %v1455_v48 = vmul.f32 %v1439_v37, %v2765_v29  ;;  %v1306_v49 = vpop.f32.mrb[18].mxu0  ;;  %v1443_v16 = vmul.f32 0.044715, %v2781_v56 }
 0x377   : > { %v1500_v53 = vmul.f32 0.7978846, %v1484_v40  ;;  %v1488_v54 = vadd.f32 %v1472_v41, %v2755_v18  ;;  %v1470_v55 = vmul.f32 %v1454_v43, %v2761_v25  ;;  %v1308_v59 = vpop.f32.mrb[19].mxu0  ;;  %v1458_v11 = vmul.f32 %v1442_v2, %v2774_v45 }
 0x378   : > { %v1501_v61 = vmul.f32 0.7978846, %v1485_v39  ;;  %v1489_v62 = vadd.f32 %v1473_v47, %v2758_v21  ;;  %v1471_v63 = vmul.f32 %v1455_v48, %v2765_v29  ;;  %v1355_v3 = vpop.f32.mrb[16].mxu1  ;;  %v2792_v17 = vadd.f32 %v1397_v8, %v1302_v38 }
 0x379   : > { %2310 = vtanh.f32 %v1500_v53  ;;  %v1504_v5 = vmul.f32 0.7978846, %v1488_v54  ;;  %v1486_v6 = vadd.f32 %v1470_v55, %v2761_v25  ;;  %v1357_v7 = vpop.f32.mrb[17].mxu1  ;;  %v1474_v20 = vmul.f32 %v1458_v11, %v2774_v45 }
 0x37a   : > { %2312 = vtanh.f32 %v1501_v61  ;;  %v1505_v9 = vmul.f32 0.7978846, %v1489_v62  ;;  %v1487_v10 = vadd.f32 %v1471_v63, %v2765_v29  ;;  %v2789_v13 = vpop.f32.mrb[18].mxu1  ;;  %v2797_v22 = vadd.f32 %v1397_v8, %v1304_v46 }
 0x37b   : > { %2314 = vtanh.f32 %v1504_v5  ;;  %v1502_v14 = vmul.f32 0.7978846, %v1486_v6  ;;  %v2794_v12 = vpop.f32.mrb[19].mxu1  ;;  %v1421_v23 = vmul.f32 0.5, %v2753_v15  ;;  %v1459_v24 = vmul.f32 %v1443_v16, %v2781_v56 }
 0x37c   : > { %2316 = vtanh.f32 %v1505_v9  ;;  %v1503_v19 = vmul.f32 0.7978846, %v1487_v10  ;;  %v1444_v26 = vmul.f32 0.044715, %v2792_v17  ;;  %v1424_v28 = vmul.f32 0.5, %v2755_v18 }
 0x37d   : > { %2318 = vtanh.f32 %v1502_v14  ;;  %v1490_v30 = vadd.f32 %v1474_v20, %v2774_v45  ;;  %v1445_v31 = vmul.f32 0.044715, %v2797_v22  ;;  %v1475_v32 = vmul.f32 %v1459_v24, %v2781_v56 }
 0x37e   : > { %2320 = vtanh.f32 %v1503_v19  ;;  %v1460_v33 = vmul.f32 %v1444_v26, %v2792_v17  ;;  %v2810_v15 = vadd.f32 %v2802_v27, %v1306_v49  ;;  %v2813_v34 = vadd.f32 %v2802_v27, %v1308_v59 }
 0x37f   : > { %v1425_v35 = vmul.f32 0.5, %v2758_v21  ;;  %v1506_v36 = vmul.f32 0.7978846, %v1490_v30  ;;  %v1461_v18 = vmul.f32 %v1445_v31, %v2797_v22  ;;  %v2817_v37 = vadd.f32 %v1397_v8, %v1355_v3 }
 0x380   : > { %v1422_v38 = vmul.f32 0.5, %v2761_v25  ;;  %v1491_v40 = vadd.f32 %v1475_v32, %v2781_v56  ;;  %v1476_v41 = vmul.f32 %v1460_v33, %v2792_v17  ;;  %v1448_v43 = vmul.f32 0.044715, %v2810_v15 }
 0x381   : > { %v1423_v46 = vmul.f32 0.5, %v2765_v29  ;;  %2322 = vtanh.f32 %v1506_v36  ;;  %v1477_v39 = vmul.f32 %v1461_v18, %v2797_v22  ;;  %v1449_v21 = vmul.f32 0.044715, %v2813_v34 }
 0x382   : > { %v1507_v48 = vmul.f32 0.7978846, %v1491_v40  ;;  %v1492_v49 = vadd.f32 %v1476_v41, %v2792_v17  ;;  %v1464_v53 = vmul.f32 %v1448_v43, %v2810_v15  ;;  %v2828_v25 = vadd.f32 %v1397_v8, %v1357_v7 }
 0x383   : > { %v2311_v47 = vpop.eup %2310  ;;  %v1493_v59 = vadd.f32 %v1477_v39, %v2797_v22  ;;  %v1465_v61 = vmul.f32 %v1449_v21, %v2813_v34  ;;  %v1446_v29 = vmul.f32 0.044715, %v2817_v37  ;;  %v2847_v43 = vadd.f32 %v2802_v27, %v2794_v12 }
 0x384   : > { %v2313_v54 = vpop.eup %2312  ;;  %v1532_v55 = vadd.f32 1.0, %v2311_v47  ;;  %2324 = vtanh.f32 %v1507_v48  ;;  %v1508_v2 = vmul.f32 0.7978846, %v1492_v49  ;;  %v1480_v3 = vmul.f32 %v1464_v53, %v2810_v15 }
 0x385   : > { %v2315_v62 = vpop.eup %2314  ;;  %v1533_v63 = vadd.f32 1.0, %v2313_v54  ;;  %v1509_v10 = vmul.f32 0.7978846, %v1493_v59  ;;  %v1481_v7 = vmul.f32 %v1465_v61, %v2813_v34  ;;  %v1447_v18 = vmul.f32 0.044715, %v2828_v25 }
 0x386   : > { %v2317_v5 = vpop.eup %2316  ;;  %v1548_v6 = vmul.f32 %v1532_v55, %v1420_v4  ;;  %v1536_v9 = vadd.f32 1.0, %v2315_v62  ;;  %2326 = vtanh.f32 %v1508_v2  ;;  %v1496_v16 = vadd.f32 %v1480_v3, %v2810_v15 }
 0x387   : > { %v2319_v8 = vpop.eup %2318  ;;  %v1549_v11 = vmul.f32 %v1533_v63, %v1421_v23  ;;  %v1537_v14 = vadd.f32 1.0, %v2317_v5  ;;  %2328 = vtanh.f32 %v1509_v10  ;;  %v1497_v26 = vadd.f32 %v1481_v7, %v2813_v34 }
 0x388   : > { %v2321_v19 = vpop.eup %2320  ;;  %v1552_v20 = vmul.f32 %v1536_v9, %v1424_v28  ;;  %v1534_v24 = vadd.f32 1.0, %v2319_v8  ;;  %v1512_v32 = vmul.f32 0.7978846, %v1496_v16  ;;  %v1462_v4 = vmul.f32 %v1446_v29, %v2817_v37 }
 0x389   : > { %v1553_v30 = vmul.f32 %v1537_v14, %v1425_v35  ;;  %v1535_v31 = vadd.f32 1.0, %v2321_v19  ;;  %v1513_v36 = vmul.f32 0.7978846, %v1497_v26  ;;  %v2842_v28 = vadd.f32 %v2802_v27, %v2789_v13 }
 0x38a   : > { %v1550_v33 = vmul.f32 %v1534_v24, %v1422_v38  ;;  %2330 = vtanh.f32 %v1512_v32  ;;  %v1478_v40 = vmul.f32 %v1462_v4, %v2817_v37  ;;  %v1463_v35 = vmul.f32 %v1447_v18, %v2828_v25 }
 0x38b   : > { %v1551_v23 = vmul.f32 %v1535_v31, %v1423_v46  ;;  %v2323_v41 = vpop.eup %2322  ;;  %2332 = vtanh.f32 %v1513_v36  ;;  %v2849_v38 = vpack.c.bf16 %v1553_v30, %v1549_v11  ;;  %v1426_v39 = vmul.f32 0.5, %v2774_v45 }
 0x38c   : > { %v1538_v46 = vadd.f32 1.0, %v2323_v41  ;;  %v1494_v21 = vadd.f32 %v1478_v40, %v2817_v37  ;;  %v1450_v47 = vmul.f32 0.044715, %v2842_v28  ;;  %v1427_v13 = vmul.f32 0.5, %v2781_v56 }
 0x38d   : > { %v1479_v48 = vmul.f32 %v1463_v35, %v2828_v25  ;;  %v1451_v49 = vmul.f32 0.044715, %v2847_v43  ;;  %1627 = vmatprep.subr.bf16.mxu0 %v2849_v38  ;;  %v1601_v53 = vpack.c.bf16 %v1552_v20, %v1548_v6  ;;  %v1428_v54 = vmul.f32 0.5, %v2792_v17 }
 0x38e   : > { %v2325_v12 = vpop.eup %2324  ;;  %v1554_v27 = vmul.f32 %v1538_v46, %v1426_v39  ;;  %v1510_v55 = vmul.f32 0.7978846, %v1494_v21  ;;  %v1466_v45 = vmul.f32 %v1450_v47, %v2842_v28  ;;  %v1429_v63 = vmul.f32 0.5, %v2797_v22 }
 0x38f   : > { %v1539_v59 = vadd.f32 1.0, %v2325_v12  ;;  %v1495_v61 = vadd.f32 %v1479_v48, %v2828_v25  ;;  %v1467_v29 = vmul.f32 %v1451_v49, %v2847_v43  ;;  %v1611_v56 = vsel %vm399_vm4, %v1601_v53, 0  ;;  %1628 = vmatpush1.bf16.msra.mxu0 %v1601_v53  ;;  %v2202_v49 = vld [vmem:[%s3016_s5 + $0x4] sm:$0xf] }
 0x390   : > { %v2327_v62 = vpop.eup %2326  ;;  %2334 = vtanh.f32 %v1510_v55  ;;  %v1482_v2 = vmul.f32 %v1466_v45, %v2842_v28  ;;  %1721 = vrot.lane.b32.xlu0 %v1611_v56, %s2416_s19  ;;  %v1862_v17 = vpack.c.bf16 %v1554_v27, %v1550_v33  ;;  %v1432_v31 = vmul.f32 0.5, %v2810_v15 }
 0x391   : > { %v2329_v3 = vpop.eup %2328  ;;  %v1555_v5 = vmul.f32 %v1539_v59, %v1427_v13  ;;  %v1540_v6 = vadd.f32 1.0, %v2327_v62  ;;  %v1511_v9 = vmul.f32 0.7978846, %v1495_v61  ;;  %v1483_v10 = vmul.f32 %v1467_v29, %v2847_v43 }
 0x392   : > { %v1541_v7 = vadd.f32 1.0, %v2329_v3  ;;  %v1498_v8 = vadd.f32 %v1482_v2, %v2842_v28  ;;  %v1872_v11 = vsel %vm698_vm8, %v1862_v17, 0  ;;  %v1613_v22 = vsel %vm401_vm7, %v1862_v17, 0 }
 0x393   : > { %v1556_v14 = vmul.f32 %v1540_v6, %v1428_v54  ;;  %2336 = vtanh.f32 %v1511_v9  ;;  %v1499_v16 = vadd.f32 %v1483_v10, %v2847_v43  ;;  %v1604_v19 = vpack.c.bf16 %v1555_v5, %v1551_v23  ;;  %1896 = vrot.lane.b32.xlu1 %v1872_v11, %s2415_s18  ;;  %v1730_v6 = vpop.permute.xlu1 %1729 }
 0x394   : > { %v2331_v20 = vpop.eup %2330  ;;  %v1557_v24 = vmul.f32 %v1541_v7, %v1429_v63  ;;  %v1514_v26 = vmul.f32 0.7978846, %v1498_v8  ;;  %1725 = vrot.lane.b32.xlu0 %v1613_v22, %s2416_s19  ;;  %v1433_v33 = vmul.f32 0.5, %v2813_v34  ;;  %v1612_v18 = vsel %vm400_vm2, %v2849_v38, 0 }
 0x395   : > { %v2333_v30 = vpop.eup %2332  ;;  %v1544_v32 = vadd.f32 1.0, %v2331_v20  ;;  %v1515_v4 = vmul.f32 0.7978846, %v1499_v16  ;;  %1668 = vmatprep.subr.bf16.mxu1 %v1604_v19  ;;  %v1870_v40 = vsel %vm696_vm3, %v1601_v53, 0  ;;  %v1614_v39 = vsel %vm402_vm0, %v1604_v19, 0 }
 0x396   : > { %v1545_v36 = vadd.f32 1.0, %v2333_v30  ;;  %2338 = vtanh.f32 %v1514_v26  ;;  %1669 = vmatpush1.bf16.msra.mxu1 %v1862_v17  ;;  %v1430_v46 = vmul.f32 0.5, %v2817_v37  ;;  %v1871_v47 = vsel %vm697_vm5, %v2849_v38, 0 }
 0x397   : > { %v1560_v23 = vmul.f32 %v1544_v32, %v1432_v31  ;;  %2340 = vtanh.f32 %v1515_v4  ;;  %1723 = vrot.lane.b32.xlu1 %v1612_v18, %s2416_s19  ;;  %v1431_v37 = vmul.f32 0.5, %v2828_v25  ;;  %v1873_v38 = vsel %vm699_vm6, %v1604_v19, 0  ;;  %v1901_v9 = vpop.permute.xlu1 %1900 }
 0x398   : > { %v1561_v15 = vmul.f32 %v1545_v36, %v1433_v33  ;;  %1892 = vrot.lane.b32.xlu0 %v1870_v40, %s2415_s18  ;;  %v1434_v45 = vmul.f32 0.5, %v2842_v28  ;;  %v1435_v50 = vmul.f32 0.5, %v2847_v43  ;;  %v1854_v43 = vld [vmem:[#allocation4 + $0x88] sm:$0xff]  ;;  %v1620_v33 = vld [vmem:[%s3016_s5] sm:$0xf] }
 0x399   : > { %v1606_v41 = vpack.c.bf16 %v1560_v23, %v1556_v14  ;;  %v1869_v3 = vpack.c.bf16 %v1859_v44, %v1854_v43 }
 0x39a   : > { %v2335_v35 = vpop.eup %2334  ;;  %v1607_v34 = vpack.c.bf16 %v1561_v15, %v1557_v24 }
 0x39b   : > { %v1542_v21 = vadd.f32 1.0, %v2335_v35  ;;  %1727 = vrot.lane.b32.xlu1 %v1614_v39, %s2416_s19  ;;  %v1616_v12 = vsel %vm399_vm4, %v1606_v41, 0  ;;  %v1879_v52 = vsel %vm700_vm9, %v1869_v3, 0  ;;  %v1875_v5 = vsel %vm696_vm3, %v1606_v41, 0 }
 0x39c   : > { %1629 = vmatprep.subr.bf16.mxu0 %v1607_v34  ;;  %1894 = vrot.lane.b32.xlu0 %v1871_v47, %s2415_s18  ;;  %v1617_v29 = vsel %vm400_vm2, %v1607_v34, 0  ;;  %v1876_v17 = vsel %vm697_vm5, %v1607_v34, 0 }
 0x39d   : > { %v2337_v13 = vpop.eup %2336  ;;  %v1558_v48 = vmul.f32 %v1542_v21, %v1430_v46  ;;  %1630 = vmatpush1.bf16.msra.mxu0 %v1606_v41 }
 0x39e   : > { %v1543_v53 = vadd.f32 1.0, %v2337_v13 }
 0x39f   : > { %1731 = vrot.lane.b32.xlu1 %v1616_v12, %s2416_s19 }
 0x3a0   : > { %v2339_v27 = vpop.eup %2338  ;;  %v1559_v54 = vmul.f32 %v1543_v53, %v1431_v37  ;;  %1898 = vrot.lane.b32.xlu0 %v1873_v38, %s2415_s18  ;;  %2203 = vmatmul.mubr.msk.bf16.vlgmr.msra.gmra.mrb[20].mxu0 %vm1623_vm12, %v2202_v49  ;;  %v2207_v37 = vld [vmem:[%s3016_s5 + $0x8] sm:$0xf] }
 0x3a1   : > { %v2341_v55 = vpop.eup %2340  ;;  %v1546_v59 = vadd.f32 1.0, %v2339_v27  ;;  %1790 = vmatprep.mubr.bf16.mxu0 %v2414_v1 }
 0x3a2   : > { %v1547_v25 = vadd.f32 1.0, %v2341_v55 }
 0x3a3   : > { %v1562_v61 = vmul.f32 %v1546_v59, %v1434_v45 }
 0x3a4   : > { %v1563_v56 = vmul.f32 %v1547_v25, %v1435_v50  ;;  %1733 = vrot.lane.b32.xlu0 %v1617_v29, %s2416_s19 }
 0x3a5   : > { %v1608_v62 = vpack.c.bf16 %v1562_v61, %v1558_v48 }
 0x3a6   : > { %v1609_v63 = vpack.c.bf16 %v1563_v56, %v1559_v54 }
 0x3a7   : > { %v1618_v2 = vsel %vm401_vm7, %v1608_v62, 0  ;;  %v1877_v58 = vsel %vm698_vm8, %v1608_v62, 0 }
 0x3a8   : > { %1670 = vmatprep.subr.bf16.mxu1 %v1609_v63  ;;  %1735 = vrot.lane.b32.xlu1 %v1618_v2, %s2416_s19  ;;  %v1619_v28 = vsel %vm402_vm0, %v1609_v63, 0  ;;  %v1878_v42 = vsel %vm699_vm6, %v1609_v63, 0 }
 0x3a9   : > { %1671 = vmatpush1.bf16.msra.mxu1 %v1608_v62  ;;  %1737 = vrot.lane.b32.xlu0 %v1619_v28, %s2416_s19  ;;  %s2350_s19 = scalar_lea.vmem %s2971_s22, 512 }
 0x3aa   : > { %p2351_p11 = scmp.ne.s32.totalorder %s2971_s22, %s2350_s19 }
 0x3ac   : > { %1904 = vrot.lane.b32.xlu1 %v1876_v17, %s2415_s18  ;;  %2204 = vmatmul.mubr.msk.bf16.vlgmr.msra.gmra.mrb[20].mxu1 %vm1623_vm12, %v2202_v49  ;;  %p2352_p12 = pnand %p2351_p11, %p2496_p5 }
 0x3ad   : > { %1906 = vrot.lane.b32.xlu0 %v1877_v58, %s2415_s18  ;;  %1831 = vmatprep.mubr.bf16.mxu1 %v2414_v1 }
 0x3ae   : > { %p2353_p13 = pneg %p2352_p12 }
 0x3b0   : > { %1908 = vrot.lane.b32.xlu1 %v1878_v42, %s2415_s18 }
 0x3b1   : > { %1910 = vrot.lane.b32.xlu0 %v1879_v52, %s2415_s18 }
 0x3b4   : > { %1902 = vrot.lane.b32.xlu1 %v1875_v5, %s2415_s18  ;;  %s2354_s18 = sshll.u32 %s2417_s9, 4  ;;  %s2355_s18 = int_to_ptr.vmem [resolvable:$false] %s2354_s18 }
 0x3b5   : > { %2020 = vperm.xlu0 %2290, %v2017_v0   ;;  %s2356_s13 = scalar_lea.vmem %s2355_s18, 1024  ;;  %p2357_p0 = scmp.lt.s32.totalorder %s2971_s22, %s2355_s18 }
 0x3b6   : > { %p2358_p1 = scmp.lt.s32.totalorder %s2356_s13, %s2350_s19 }
 0x3b8   : > { %p2359_p2 = por %p2358_p1, %p2357_p0 }
 0x3ba   : > { %p2360_p3 = pnand %p2359_p2, %p2353_p13 }
 0x402   : > { %v1722_v10 = vpop.permute.xlu0 %1721 }
 0x403   : > { %v1739_v14 = vsel %vm537_vm1, %v1720_v60, %v1722_v10 }
 0x405   : > { %v1897_v7 = vpop.permute.xlu1 %1896 }
 0x406   : > { %v1726_v8 = vpop.permute.xlu0 %1725 }
 0x409   : > { %v1724_v57 = vpop.permute.xlu1 %1723 }
 0x40a   : > { %v1893_v11 = vpop.permute.xlu0 %1892  ;;  %v1740_v22 = vsel %vm537_vm1, %v1722_v10, %v1724_v57  ;;  %v1741_v20 = vsel %vm537_vm1, %v1724_v57, %v1726_v8  ;;  %v2029_v57 = vld [vmem:[#allocation3 + $0x18] sm:$0xff] }
 0x40b   : > { %1758 = vmatprep.subr.bf16.mxu0 %v1740_v22 }
 0x40c   : > { %1759 = vmatpush1.bf16.msra.mxu0 %v1739_v14 }
 0x40d   : > { %v1728_v16 = vpop.permute.xlu1 %1727 }
 0x40e   : > { %v1895_v51 = vpop.permute.xlu0 %1894  ;;  %v1742_v19 = vsel %vm537_vm1, %v1726_v8, %v1728_v16 }
 0x40f   : > { %1799 = vmatprep.subr.bf16.mxu1 %v1742_v19  ;;  %v1913_v4 = vsel %vm394_vm15, %v1895_v51, %v1897_v7  ;;  %v1912_v23 = vsel %vm394_vm15, %v1893_v11, %v1895_v51  ;;  %v2030_v51 = vld [vmem:[#allocation3 + $0x20] sm:$0xff] }
 0x410   : > { %1800 = vmatpush1.bf16.msra.mxu1 %v1741_v20  ;;  %v2027_v20 = vld [vmem:[#allocation3 + $0x8] sm:$0xff] }
 0x411   : > { %v1732_v26 = vpop.permute.xlu1 %1731 }
 0x412   : > { %v1899_v24 = vpop.permute.xlu0 %1898  ;;  %v1743_v32 = vsel %vm537_vm1, %v1730_v6, %v1732_v26 }
 0x413   : > { %v1915_v35 = vsel %vm394_vm15, %v1899_v24, %v1901_v9  ;;  %v1914_v46 = vsel %vm394_vm15, %v1897_v7, %v1899_v24 }
 0x416   : > { %v1734_v30 = vpop.permute.xlu0 %1733 }
 0x417   : > { %v1744_v31 = vsel %vm537_vm1, %v1732_v26, %v1734_v30 }
 0x418   : > { %1760 = vmatprep.subr.bf16.mxu0 %v1744_v31  ;;  %v2028_v31 = vld [vmem:[#allocation3 + $0x10] sm:$0xff] }
 0x419   : > { %1761 = vmatpush1.bf16.msra.mxu0 %v1743_v32 }
 0x41a   : > { %v1736_v36 = vpop.permute.xlu1 %1735  ;;  %1931 = vmatprep.subr.bf16.mxu0 %v1913_v4 }
 0x41b   : > { %v1738_v18 = vpop.permute.xlu0 %1737  ;;  %v1745_v15 = vsel %vm537_vm1, %v1734_v30, %v1736_v36 }
 0x41c   : > { %v1746_v40 = vsel %vm537_vm1, %v1736_v36, %v1738_v18  ;;  %2205 = vmatmul.mubr.msk.bf16.vlgmr.msra.gmra.mrb[24].mxu0 %vm1623_vm12, %v1620_v33 }
 0x41d   : > { %1801 = vmatprep.subr.bf16.mxu1 %v1746_v40  ;;  %1932 = vmatpush1.bf16.msra.mxu0 %v1912_v23 }
 0x41e   : > { %v1905_v41 = vpop.permute.xlu1 %1904  ;;  %1802 = vmatpush1.bf16.msra.mxu1 %v1745_v15  ;;  %1963 = vmatprep.mubr.bf16.mxu0 %v2414_v1 }
 0x41f   : > { %v1907_v34 = vpop.permute.xlu0 %1906  ;;  %1972 = vmatprep.subr.bf16.mxu1 %v1915_v35 }
 0x420   : > { %v1917_v39 = vsel %vm394_vm15, %v1905_v41, %v1907_v34 }
 0x421   : > { %2206 = vmatmul.mubr.msk.bf16.vlgmr.msra.gmra.mrb[24].mxu1 %vm1623_vm12, %v1620_v33  ;;  %1933 = vmatprep.subr.bf16.mxu0 %v1917_v39 }
 0x422   : > { %v1909_v21 = vpop.permute.xlu1 %1908  ;;  %1973 = vmatpush1.bf16.msra.mxu1 %v1914_v46  ;;  %2004 = vmatprep.mubr.bf16.mxu1 %v2414_v1 }
 0x423   : > { %v1911_v47 = vpop.permute.xlu0 %1910  ;;  %v1918_v48 = vsel %vm394_vm15, %v1907_v34, %v1909_v21 }
 0x424   : > { %v1919_v13 = vsel %vm394_vm15, %v1909_v21, %v1911_v47 }
 0x425   : > { %1974 = vmatprep.subr.bf16.mxu1 %v1919_v13 }
 0x426   : > { %v1903_v49 = vpop.permute.xlu1 %1902  ;;  %1975 = vmatpush1.bf16.msra.mxu1 %v1918_v48 }
 0x427   : > { %v1916_v53 = vsel %vm394_vm15, %v1903_v49, %v1905_v41 }
 0x428   : > { %1934 = vmatpush1.bf16.msra.mxu0 %v1916_v53 }
 0x429   : > { %2209 = vmatmul.mubr.msk.bf16.vlgmr.msra.gmra.mrb[28].mxu1 %vm1623_vm12, %v2207_v37 }
 0x42b   : > { %2208 = vmatmul.mubr.msk.bf16.vlgmr.msra.gmra.mrb[28].mxu0 %vm1623_vm12, %v2207_v37 }
 0x434   : > { %v2021_v3 = vpop.permute.xlu0 %2020 }
 0x473   : > { %v1661_v1 = vpop.f32.mrb[20].mxu0 }
 0x474   : > { %v1663_v12 = vpop.f32.mrb[21].mxu0 }
 0x475   : > { %v1665_v38 = vpop.f32.mrb[22].mxu0 }
 0x476   : > { %v1666_v27 = vpop.f32.mrb[23].mxu0 }
 0x47f   : > { %v1702_v54 = vpop.f32.mrb[20].mxu1 }
 0x480   : > { %v1704_v55 = vpop.f32.mrb[21].mxu1 }
 0x481   : > { %v1706_v45 = vpop.f32.mrb[22].mxu1 }
 0x482   : > { %v1707_v59 = vpop.f32.mrb[23].mxu1 }
 0x4ef   : > { %v1792_v50 = vpop.f32.mrb[24].mxu0 }
 0x4f0   : > { %v1793_v25 = vadd.f32 %v1792_v50, %v1661_v1  ;;  %v1794_v61 = vpop.f32.mrb[25].mxu0 }
 0x4f1   : > { %v1795_v29 = vadd.f32 %v1794_v61, %v1663_v12  ;;  %v1796_v56 = vpop.f32.mrb[26].mxu0 }
 0x4f2   : > { %v1797_v62 = vpop.f32.mrb[27].mxu0 }
 0x4f4   : > { %v1833_v63 = vpop.f32.mrb[24].mxu1 }
 0x4f5   : > { %v1834_v2 = vadd.f32 %v1833_v63, %v1702_v54  ;;  %v1835_v28 = vpop.f32.mrb[25].mxu1 }
 0x4f6   : > { %v1836_v43 = vadd.f32 %v1835_v28, %v1704_v55  ;;  %v1837_v44 = vpop.f32.mrb[26].mxu1 }
 0x4f7   : > { %v1838_v17 = vpop.f32.mrb[27].mxu1 }
 0x4fc   : > { %v2006_v58 = vpop.f32.mrb[28].mxu1 }
 0x4fd   : > { %v2015_v42 = vadd.f32 %v2006_v58, %v1834_v2  ;;  %v2008_v52 = vpop.f32.mrb[29].mxu1 }
 0x4fe   : > { %v1965_v0 = vpop.f32.mrb[28].mxu0  ;;  %v2016_v5 = vadd.f32 %v2008_v52, %v1836_v43  ;;  %v2010_v6 = vpop.f32.mrb[30].mxu1 }
 0x4ff   : > { %v2013_v60 = vadd.f32 %v1965_v0, %v1793_v25  ;;  %v1967_v9 = vpop.f32.mrb[29].mxu0  ;;  %v2025_v10 = vadd.f32 %v2021_v3, %v2015_v42  ;;  %v2011_v7 = vpop.f32.mrb[31].mxu1 }
 0x500   : > { %v2014_v8 = vadd.f32 %v1967_v9, %v1795_v29  ;;  %v2026_v11 = vadd.f32 %v2021_v3, %v2016_v5  ;;  %v1969_v22 = vpop.f32.mrb[30].mxu0 }
 0x501   : > { %v2023_v14 = vadd.f32 %v2021_v3, %v2013_v60  ;;  %v2033_v16 = vadd.f32 %v2029_v57, %v2025_v10  ;;  %v1970_v19 = vpop.f32.mrb[31].mxu0 }
 0x502   : > { %v2024_v24 = vadd.f32 %v2021_v3, %v2014_v8  ;;  %v2034_v26 = vadd.f32 %v2030_v51, %v2026_v11 }
 0x503   : > { %v2031_v30 = vadd.f32 %v2027_v20, %v2023_v14  ;;  %v2041_v32 = vmul.f32 0.044715, %v2033_v16  ;;  %v2037_v27 = vmul.f32 0.5, %v2033_v16 }
 0x504   : > { %v2032_v4 = vadd.f32 %v2028_v31, %v2024_v24  ;;  %v2042_v33 = vmul.f32 0.044715, %v2034_v26  ;;  %v2038_v45 = vmul.f32 0.5, %v2034_v26 }
 0x505   : > { %v2039_v36 = vmul.f32 0.044715, %v2031_v30  ;;  %v2045_v18 = vmul.f32 %v2041_v32, %v2033_v16  ;;  %v2035_v25 = vmul.f32 0.5, %v2031_v30 }
 0x506   : > { %v2040_v23 = vmul.f32 0.044715, %v2032_v4  ;;  %v2046_v40 = vmul.f32 %v2042_v33, %v2034_v26  ;;  %v2036_v56 = vmul.f32 0.5, %v2032_v4 }
 0x507   : > { %v2043_v15 = vmul.f32 %v2039_v36, %v2031_v30  ;;  %v2049_v41 = vmul.f32 %v2045_v18, %v2033_v16 }
 0x508   : > { %v2044_v35 = vmul.f32 %v2040_v23, %v2032_v4  ;;  %v2050_v34 = vmul.f32 %v2046_v40, %v2034_v26 }
 0x509   : > { %v2047_v39 = vmul.f32 %v2043_v15, %v2031_v30  ;;  %v2053_v46 = vadd.f32 %v2049_v41, %v2033_v16 }
 0x50a   : > { %v2048_v21 = vmul.f32 %v2044_v35, %v2032_v4  ;;  %v2054_v47 = vadd.f32 %v2050_v34, %v2034_v26 }
 0x50b   : > { %v2051_v13 = vadd.f32 %v2047_v39, %v2031_v30  ;;  %v2057_v48 = vmul.f32 0.7978846, %v2053_v46 }
 0x50c   : > { %v2052_v49 = vadd.f32 %v2048_v21, %v2032_v4  ;;  %v2058_v37 = vmul.f32 0.7978846, %v2054_v47 }
 0x50d   : > { %v2055_v53 = vmul.f32 0.7978846, %v2051_v13  ;;  %2342 = vtanh.f32 %v2057_v48 }
 0x50e   : > { %v2056_v1 = vmul.f32 0.7978846, %v2052_v49  ;;  %2344 = vtanh.f32 %v2058_v37 }
 0x50f   : > { %2346 = vtanh.f32 %v2055_v53 }
 0x510   : > { %2348 = vtanh.f32 %v2056_v1 }
 0x517   : > { %v2343_v12 = vpop.eup %2342 }
 0x518   : > { %v2345_v38 = vpop.eup %2344  ;;  %v2065_v54 = vadd.f32 1.0, %v2343_v12 }
 0x519   : > { %v2347_v55 = vpop.eup %2346  ;;  %v2066_v59 = vadd.f32 1.0, %v2345_v38 }
 0x51a   : > { %v2349_v50 = vpop.eup %2348  ;;  %v2063_v61 = vadd.f32 1.0, %v2347_v55  ;;  %v2069_v29 = vmul.f32 %v2065_v54, %v2037_v27 }
 0x51b   : > { %v2064_v62 = vadd.f32 1.0, %v2349_v50  ;;  %v2070_v63 = vmul.f32 %v2066_v59, %v2038_v45 }
 0x51c   : > { %v2067_v2 = vmul.f32 %v2063_v61, %v2035_v25  ;;  %2073 = vst [vmem:[%s272_s21 + $0x10] sm:$0xff] %v2069_v29 }
 0x51d   : > { %v2068_v28 = vmul.f32 %v2064_v62, %v2036_v56  ;;  %2074 = vst [vmem:[%s272_s21 + $0x18] sm:$0xff] %v2070_v63 }
 0x51e   : > { %2071 = vst [vmem:[%s272_s21] sm:$0xff] %v2067_v2 }
 0x51f   : > { %2072 = vst [vmem:[%s272_s21 + $0x8] sm:$0xff] %v2068_v28 }
 0x520   : > { %2363 = shalt.err (!%p2360_p3)
}
 0x521   : > { %s2364_s14 = scalar_lea.hbm %s2969_s8, 512  ;;  %s2368_s17 = scalar_lea.hbm %s3018_s7, 1024 }
 0x522   : > { %p2365_p4 = scmp.ne.s32.totalorder %s2969_s8, %s2364_s14  ;;  %p2369_p9 = scmp.lt.u32.totalorder %s2969_s8, %s3018_s7 }
 0x523   : > { %p2370_p10 = scmp.lt.u32.totalorder %s2368_s17, %s2364_s14  ;;  %p2372_p12 = scmp.lt.u32.totalorder %s2364_s14, %s2969_s8 }
 0x524   : > { %p2366_p7 = pnand %p2365_p4, %p2496_p5 }
 0x525   : > { %p2371_p11 = por %p2370_p10, %p2369_p9 }
 0x526   : > { %p2367_p8 = pneg %p2366_p7 }
 0x527   : > { %p2373_p13 = por %p2372_p12, %p2371_p11 }
 0x529   : > { %p2374_p0 = pnand %p2373_p13, %p2367_p8 }
 0x52b   : > { %2377 = shalt.err (!%p2374_p0)
}
 0x52c   : > { %2248 = dma.vmem_to_hbm [thread:$0]  (%p2496_p5), %s2971_s22, 512, %s2969_s8, %s2076_s28  }
 0x52d PF: > { %p2254_p1 = scmp.ge.s32.totalorder %s2412_s27, 2  ;;  %s2102_s23 = sand.u32 1, %s2400_s24  }
 0x52e   : > { %s2103_s29 = scalar_lea.sflag [#allocation6], %s2102_s23 }
 0x52f   : > { %p2251_p2 = pnand %p2254_p1, %p2500_p6 }
 0x531   : > { %2395 = dma.done.wait (!%p2251_p2), %s2103_s29, 512  }
 0x532   : > { %2397 = vsyncadd (!%p2251_p2), %s2103_s29, 4294966784  ;;  %p17_p3 = scmp.ge.s32.totalorder %s2483_s30, 4   ;;  %s3021_s24 = smov %s2404_s25 }
 0x533   : > { %s3022_s25 = smov %s2408_s26  ;;  %s3023_s26 = smov %s2494_s10 }
 0x534   : > { %s3024_s27 = smov %s2483_s30  ;;  %19 = sbr.rel (!%p17_p3) target bundleno = 3 (0x3), region = 89 }
 0x53b   :  { %2108 = vsyncpa [#allocation6], 1 }
 0x53c   :  { %2110 = vsyncpa [#allocation6 + $0x1], 1 }

</bundles_post_ra>
